<compile_context>
chip_gen: v5e
topology: v5e:2x2
jax: 0.10.0
libtpu: 0.0.40
codegen_flags: <defaults>
</compile_context>

<pallas_src>
import functools
import numpy as np
import jax
import jax.numpy as jnp
from jax.experimental import pallas as pl
from jax.experimental.pallas import tpu as pltpu

MASK_ID = 0        # token_map['MASK']
EMPTY_OPRA_ID = 1  # token_map['EMPTY_OPRA']

P = 128            # padded lane width (hidden / d_inner / 3*D / 4*D all fit in 128 here)
NB = 16            # bias-slab rows per layer (10 used, padded for sublane alignment)

# bias-slab row indices (per layer)
_B1, _B2, _GPW, _BPW, _BQKV1, _BO1, _GN, _BN, _BQKV2, _BO2 = range(10)


# ----------------------------------------------------------------------------- glue
def get_sinusoid_encoding_table(n_position, d_hid, padding_idx=None):
    def cal_angle(position, hid_idx):
        return position / np.power(10000, 2 * (hid_idx // 2) / d_hid)

    table = np.array([[cal_angle(p, j) for j in range(d_hid)] for p in range(n_position)],
                     dtype=np.float64)
    table[:, 0::2] = np.sin(table[:, 0::2])
    table[:, 1::2] = np.cos(table[:, 1::2])
    if padding_idx is not None:
        table[padding_idx] = 0.0
    return jnp.asarray(table, dtype=jnp.float32)


# ----------------------------------------------------------------------------- fused kernel
def _fused_star_kernel(embs_ref, keep_ref, prevok_ref, nextok_ref, oh_ref, sbd_ref,
                       w4_ref, wo_ref, bias_ref,
                       nodes_ref, relay_ref,
                       qk_buf,
                       *, B, L, H, D, d_k):
    BL = B * L
    f32 = jnp.float32
    bf16 = jnp.bfloat16
    inv_sqrt = 1.0 / float(np.sqrt(d_k))
    inv_H = 1.0 / float(H)

    lane = jax.lax.broadcasted_iota(jnp.int32, (1, P), 1)
    lane_mask = (lane < H).astype(f32)                       # 1.0 on the real hidden lanes

    bias = bias_ref[...]                                     # (NB, P) f32

    def b(i):
        return bias[i:i + 1, :]                              # (1, P)

    def mm(x, w):
        # MXU push: bf16 operands, f32 accumulation.
        return jnp.dot(x.astype(bf16), w.astype(bf16), preferred_element_type=f32)

    def layer_norm(x, g, beta):
        xm = x * lane_mask                                   # stats strictly over the H real lanes
        mu = jnp.sum(xm, axis=-1, keepdims=True) * inv_H
        d = (xm - mu) * lane_mask
        var = jnp.sum(d * d, axis=-1, keepdims=True) * inv_H
        return (d * jax.lax.rsqrt(var + 1e-5) * g + beta) * lane_mask

    def leaky(x):
        return jnp.where(x >= 0, x, 0.01 * x)

    def bcast_seq(a):
        # (B, X) -> (BL, X): per-sequence row replicated over its L positions (tiny K=B matmul).
        return jnp.dot(oh_ref[...], a, preferred_element_type=f32)

    def seq_sum(a):
        return jnp.sum(a.reshape(B, L, a.shape[-1]), axis=1)

    def seq_max(a):
        return jnp.max(a.reshape(B, L, a.shape[-1]), axis=1)

    # ---- layer-0 init: nodes = embs, relay = per-sequence mean over L ----
    @pl.when(pl.program_id(0) == 0)
    def _():
        e0 = embs_ref[...]
        nodes_ref[...] = e0
        relay_ref[...] = jnp.zeros_like(relay_ref)
        relay_ref[0:B, :] = jnp.mean(e0.reshape(B, L, P), axis=1)

    nodes = nodes_ref[...]          # (BL, P)  resident state across layers
    relay_pad = relay_ref[...]      # (RB, P)  resident state (rows >= B unused)
    keep = keep_ref[...]            # (BL, 1)  1.0 real token rows, 0.0 padded rows
    prevok = prevok_ref[...]        # (BL, 1)  row has a previous row in the same sequence
    nextok = nextok_ref[...]        # (BL, 1)  row has a next row in the same sequence
    sbd = sbd_ref[...]              # (P, P)   bf16 block-diagonal per-head (d_k-group) selector

    # ---- PositionwiseFeedForward (two 1x1 convs) + residual + LayerNorm ----
    h1 = jnp.maximum(mm(nodes, w4_ref[0]) + b(_B1), 0.0)
    h2 = mm(h1, w4_ref[1]) + b(_B2)
    x = layer_norm(h2 + nodes, b(_GPW), b(_BPW))                               # (BL, P)

    # ---- ring attention (_MSA1): windows {prev,self,next} + relay column ----
    xr = jnp.concatenate([x, relay_pad], axis=0)                               # (BL+RB, P): relay projected once/seq
    proj1 = mm(xr, w4_ref[2]) + b(_BQKV1)                                      # q|k|v packed along lanes
    q = proj1[:BL, 0:D]                                                        # (BL, D)
    kv = proj1[:BL, D:3 * D]                                                   # (BL, 2D)  k|v
    akv = bcast_seq(proj1[BL:BL + B, D:3 * D])                                 # (BL, 2D)  relay k|v per position
    kv_prev = pltpu.roll(kv, shift=1, axis=0) * prevok                         # zero-padded unfold (seq starts)
    kv_next = pltpu.roll(kv, shift=BL - 1, axis=0) * nextok                    # zero-padded unfold (seq ends)
    # lane-pack the 4 window q*k products -> one full-K block-diagonal MXU score push (4*D == 128)
    qk_buf[:, 0:D] = q * kv_prev[:, 0:D]
    qk_buf[:, D:2 * D] = q * kv[:, 0:D]
    qk_buf[:, 2 * D:3 * D] = q * kv_next[:, 0:D]
    qk_buf[:, 3 * D:4 * D] = q * akv[:, 0:D]
    s_rep = mm(qk_buf[...], sbd) * inv_sqrt                                    # per-head scores, replicated on d_k lanes
    s_p, s_c = s_rep[:, 0:D], s_rep[:, D:2 * D]
    s_x, s_a = s_rep[:, 2 * D:3 * D], s_rep[:, 3 * D:4 * D]
    m = jnp.maximum(jnp.maximum(s_p, s_c), jnp.maximum(s_x, s_a))
    e_p, e_c = jnp.exp(s_p - m), jnp.exp(s_c - m)
    e_x, e_a = jnp.exp(s_x - m), jnp.exp(s_a - m)
    inv_z = 1.0 / (e_p + e_c + e_x + e_a)                                      # exact softmax normalization
    att = (e_p * kv_prev[:, D:2 * D] + e_c * kv[:, D:2 * D]
           + e_x * kv_next[:, D:2 * D] + e_a * akv[:, D:2 * D]) * inv_z        # (BL, D)
    ring = mm(att, wo_ref[0]) + b(_BO1)
    new_nodes = leaky(layer_norm(ring, b(_GN), b(_BN)))                        # (BL, P)

    # ---- star attention (_MSA2): relay attends over [relay ; new_nodes], padding masked ----
    star_in = jnp.concatenate([new_nodes, relay_pad], axis=0)                  # (BL+RB, P): shared QKV push
    proj2 = mm(star_in, w4_ref[3]) + b(_BQKV2)
    k_s = proj2[:BL, D:2 * D]
    v_s = proj2[:BL, 2 * D:3 * D]
    q_r = proj2[BL:BL + B, 0:D]
    v_r = proj2[BL:BL + B, 2 * D:3 * D]
    qk2 = jnp.concatenate([bcast_seq(q_r) * k_s,
                           proj2[BL:, 0:D] * proj2[BL:, D:2 * D]], axis=0)     # node + relay scores, one push
    s2 = mm(qk2, sbd[0:D, 0:D]) * inv_sqrt                                     # per-head scores replicated
    s_n = s2[:BL] + (keep - 1.0) * 1e30                                        # mask padded rows BEFORE the max
    s_r = s2[BL:BL + B]
    m2 = jnp.maximum(seq_max(s_n), s_r)                                        # (B, D)
    e_n = jnp.exp(s_n - bcast_seq(m2))                                         # padded rows underflow to exactly 0
    e_r = jnp.exp(s_r - m2)                                                    # (B, D)
    z2 = e_r + seq_sum(e_n)
    att2 = (e_r * v_r + seq_sum(e_n * v_s)) / z2                               # exact normalization, (B, D)
    new_relay = leaky(mm(att2, wo_ref[1]) + b(_BO2))                           # (B, P)

    # carry state in the resident output blocks; HBM writeback only after the last layer
    nodes_ref[...] = new_nodes * keep                                          # nodes.masked_fill_(ex_mask, 0)
    relay_ref[0:B, :] = new_relay


# ----------------------------------------------------------------------------- parameters
def init_params(key, n_src_vocab, d_word_vec, n_layers, n_head, d_k, d_inner, len_max_seq):
    H = 3 * d_word_vec
    D = n_head * d_k
    assert H <= P and d_inner <= P and 4 * D == P and D % 8 == 0, "demo sizing assumption"

    keys = jax.random.split(key, 1 + n_layers)
    word_emb = jax.random.normal(keys[0], (n_src_vocab, d_word_vec), jnp.float32)
    pos_table = get_sinusoid_encoding_table(len_max_seq, H, padding_idx=0)

    def w(k, shape, scale=0.1):
        return np.asarray(jax.random.normal(k, shape, jnp.float32)) * scale

    W4 = np.zeros((n_layers * 4, P, P), np.float32)    # w1 | w2 | wqkv_ring | wqkv_star
    WO = np.zeros((n_layers * 2, D, P), np.float32)    # wo_ring | wo_star
    BIAS = np.zeros((n_layers * NB, P), np.float32)
    for i in range(n_layers):
        ks = jax.random.split(keys[1 + i], 22)
        w4 = W4[4 * i:4 * i + 4]
        wo = WO[2 * i:2 * i + 2]
        bb = BIAS[NB * i:NB * (i + 1)]
        # PositionwiseFeedForward + its LayerNorm
        w4[0, :H, :d_inner] = w(ks[0], (H, d_inner))
        w4[1, :d_inner, :H] = w(ks[1], (d_inner, H))
        bb[_B1, :d_inner] = w(ks[2], (d_inner,), 0.01)
        bb[_B2, :H] = w(ks[3], (H,), 0.01)
        bb[_GPW, :H] = 1.0
        bb[_BPW, :H] = w(ks[4], (H,), 0.01)
        # ring attention (_MSA1): q|k|v packed along lanes
        w4[2, :H, 0:D] = w(ks[5], (H, D))
        w4[2, :H, D:2 * D] = w(ks[6], (H, D))
        w4[2, :H, 2 * D:3 * D] = w(ks[7], (H, D))
        bb[_BQKV1, 0:D] = w(ks[8], (D,), 0.01)
        bb[_BQKV1, D:2 * D] = w(ks[9], (D,), 0.01)
        bb[_BQKV1, 2 * D:3 * D] = w(ks[10], (D,), 0.01)
        wo[0, :, :H] = w(ks[11], (D, H))
        bb[_BO1, :H] = w(ks[12], (H,), 0.01)
        bb[_GN, :H] = 1.0
        bb[_BN, :H] = w(ks[13], (H,), 0.01)
        # star attention (_MSA2): q|k|v packed along lanes
        w4[3, :H, 0:D] = w(ks[14], (H, D))
        w4[3, :H, D:2 * D] = w(ks[15], (H, D))
        w4[3, :H, 2 * D:3 * D] = w(ks[16], (H, D))
        bb[_BQKV2, 0:D] = w(ks[17], (D,), 0.01)
        bb[_BQKV2, D:2 * D] = w(ks[18], (D,), 0.01)
        bb[_BQKV2, 2 * D:3 * D] = w(ks[19], (D,), 0.01)
        wo[1, :, :H] = w(ks[20], (D, H))
        bb[_BO2, :H] = w(ks[21], (H,), 0.01)

    # block-diagonal per-head selector: SBD[i, j] = 1 iff lanes i, j belong to the same d_k group
    g = np.arange(P) // d_k
    SBD = (g[:, None] == g[None, :]).astype(np.float32)

    return {
        'word_emb': word_emb,
        'pos_table': pos_table,
        'W4': jnp.asarray(W4, dtype=jnp.bfloat16),      # bf16 weight slabs (MXU-native, half the DMA)
        'WO': jnp.asarray(WO, dtype=jnp.bfloat16),
        'BIAS': jnp.asarray(BIAS),                      # biases / LayerNorm params stay f32
        'SBD': jnp.asarray(SBD, dtype=jnp.bfloat16),
    }


# ----------------------------------------------------------------------------- forward
def forward(src_seq, params, n_head, d_k, d_word_vec):
    # src_seq: (B, L, 3) int32, already padded with [MASK, EMPTY_OPRA, EMPTY_OPRA]
    B, L, _ = src_seq.shape
    H = 3 * d_word_vec
    D = n_head * d_k
    BL = B * L
    RB = ((B + 7) // 8) * 8                             # relay rows padded to a sublane tile
    n_layers = params['BIAS'].shape[0] // NB

    # embedding gather + sinusoid positional embedding (XLA glue)
    emb = params['word_emb'][src_seq].reshape(B, L, H)
    embs = emb + params['pos_table'][:L][None, :, :]
    embs_p = jnp.zeros((BL, P), jnp.float32).at[:, :H].set(
        embs.reshape(BL, H).astype(jnp.float32))

    # compact per-row metadata (no (BL, 128) broadcast slabs streamed from HBM)
    keep = (src_seq[:, :, 0] != MASK_ID).reshape(BL, 1).astype(jnp.float32)
    pos_in_seq = jnp.arange(BL) % L
    prevok = (pos_in_seq != 0).astype(jnp.float32).reshape(BL, 1)
    nextok = (pos_in_seq != L - 1).astype(jnp.float32).reshape(BL, 1)
    onehot = (jnp.arange(BL)[:, None] // L == jnp.arange(B)[None, :]).astype(jnp.float32)

    kernel = functools.partial(_fused_star_kernel, B=B, L=L, H=H, D=D, d_k=d_k)
    nodes_p, relay_p = pl.pallas_call(
        kernel,
        out_shape=(jax.ShapeDtypeStruct((BL, P), jnp.float32),
                   jax.ShapeDtypeStruct((RB, P), jnp.float32)),
        grid=(n_layers,),
        in_specs=[
            pl.BlockSpec((BL, P), lambda l: (0, 0)),          # embeddings (read at layer 0)
            pl.BlockSpec((BL, 1), lambda l: (0, 0)),          # keep (real-token rows)
            pl.BlockSpec((BL, 1), lambda l: (0, 0)),          # prev-valid
            pl.BlockSpec((BL, 1), lambda l: (0, 0)),          # next-valid
            pl.BlockSpec((BL, B), lambda l: (0, 0)),          # row -> sequence one-hot
            pl.BlockSpec((P, P), lambda l: (0, 0)),           # block-diag head selector (bf16)
            pl.BlockSpec((4, P, P), lambda l: (l, 0, 0)),     # per-layer W4 slab (bf16)
            pl.BlockSpec((2, D, P), lambda l: (l, 0, 0)),     # per-layer WO slab (bf16)
            pl.BlockSpec((NB, P), lambda l: (l, 0)),          # per-layer bias / LN slab (f32)
        ],
        out_specs=(pl.BlockSpec((BL, P), lambda l: (0, 0)),   # resident nodes state / output
                   pl.BlockSpec((RB, P), lambda l: (0, 0))),  # resident relay state / output
        scratch_shapes=[pltpu.VMEM((BL, P), jnp.float32)],    # lane-packing buffer for ring q*k
        compiler_params=pltpu.CompilerParams(
            dimension_semantics=("arbitrary",),               # layers carry state sequentially
            vmem_limit_bytes=32 * 1024 * 1024),
    )(embs_p, keep, prevok, nextok, onehot, params['SBD'],
      params['W4'], params['WO'], params['BIAS'])

    nodes = nodes_p[:, :H].reshape(B, L, H)
    relay = relay_p[:B, :H]
    return nodes, relay


# ----------------------------------------------------------------------------- numpy reference
def reference_forward(src_seq, params, n_head, d_k, d_word_vec, d_inner):
    src = np.asarray(src_seq)
    B, L, _ = src.shape
    H = 3 * d_word_vec
    D = n_head * d_k
    W4 = np.asarray(params['W4']).astype(np.float64)
    WO = np.asarray(params['WO']).astype(np.float64)
    BIAS = np.asarray(params['BIAS']).astype(np.float64)
    word_emb = np.asarray(params['word_emb']).astype(np.float64)
    pos = np.asarray(params['pos_table']).astype(np.float64)
    n_layers = BIAS.shape[0] // NB

    def ln(x, g, bta, eps=1e-5):
        mu = x.mean(-1, keepdims=True)
        var = ((x - mu) ** 2).mean(-1, keepdims=True)
        return (x - mu) / np.sqrt(var + eps) * g + bta

    def leaky(x):
        return np.where(x >= 0, x, 0.01 * x)

    embs = word_emb[src].reshape(B, L, H) + pos[:L][None]
    pad_mask = src[:, :, 0] == MASK_ID

    nodes = embs.copy()
    relay = embs.mean(axis=1)
    for i in range(n_layers):
        w4 = W4[4 * i:4 * i + 4]
        wo = WO[2 * i:2 * i + 2]
        bb = BIAS[NB * i:NB * (i + 1)]
        w1, w2 = w4[0, :H, :d_inner], w4[1, :d_inner, :H]
        wq, wk, wv = w4[2, :H, :D], w4[2, :H, D:2 * D], w4[2, :H, 2 * D:3 * D]
        wq2, wk2, wv2 = w4[3, :H, :D], w4[3, :H, D:2 * D], w4[3, :H, 2 * D:3 * D]
        wo1, wo2 = wo[0, :, :H], wo[1, :, :H]
        b1, b2, gpw, bpw = bb[_B1, :d_inner], bb[_B2, :H], bb[_GPW, :H], bb[_BPW, :H]
        bq, bk, bv = bb[_BQKV1, :D], bb[_BQKV1, D:2 * D], bb[_BQKV1, 2 * D:3 * D]
        bo1, gn, bn = bb[_BO1, :H], bb[_GN, :H], bb[_BN, :H]
        bq2, bk2, bv2 = bb[_BQKV2, :D], bb[_BQKV2, D:2 * D], bb[_BQKV2, 2 * D:3 * D]
        bo2 = bb[_BO2, :H]

        # PositionwiseFeedForward + residual + LayerNorm
        x = ln(np.maximum(nodes @ w1 + b1, 0.0) @ w2 + b2 + nodes, gpw, bpw)

        # ring attention (window {prev,self,next} zero padded) + relay column
        q, k, v = x @ wq + bq, x @ wk + bk, x @ wv + bv
        ak, av = relay @ wk + bk, relay @ wv + bv
        zero = np.zeros((B, 1, D))
        k_win = np.stack([np.concatenate([zero, k[:, :-1]], 1), k,
                          np.concatenate([k[:, 1:], zero], 1),
                          np.broadcast_to(ak[:, None, :], k.shape)], axis=-1)
        v_win = np.stack([np.concatenate([zero, v[:, :-1]], 1), v,
                          np.concatenate([v[:, 1:], zero], 1),
                          np.broadcast_to(av[:, None, :], v.shape)], axis=-1)
        s = (q[..., None] * k_win).reshape(B, L, n_head, d_k, 4).sum(3) / np.sqrt(d_k)
        s = s - s.max(-1, keepdims=True)
        a = np.exp(s)
        a = a / a.sum(-1, keepdims=True)
        att = (a[:, :, :, None, :] * v_win.reshape(B, L, n_head, d_k, 4)).sum(-1).reshape(B, L, D)
        new_nodes = leaky(ln(att @ wo1 + bo1, gn, bn))

        # star attention over [relay ; new_nodes], padding masked
        y = np.concatenate([relay[:, None, :], new_nodes], axis=1)
        q2 = (relay @ wq2 + bq2).reshape(B, 1, n_head, d_k)
        k2 = (y @ wk2 + bk2).reshape(B, L + 1, n_head, d_k)
        v2 = (y @ wv2 + bv2).reshape(B, L + 1, n_head, d_k)
        s2 = (q2 * k2).sum(-1) / np.sqrt(d_k)
        smask = np.concatenate([np.zeros((B, 1), bool), pad_mask], axis=1)
        s2 = np.where(smask[:, :, None], -np.inf, s2)
        s2 = s2 - s2.max(1, keepdims=True)
        a2 = np.exp(s2)
        a2 = a2 / a2.sum(1, keepdims=True)
        att2 = (a2[..., None] * v2).sum(1).reshape(B, D)
        relay = leaky(att2 @ wo2 + bo2)
        nodes = np.where(pad_mask[:, :, None], 0.0, new_nodes)
    return nodes, relay


# ----------------------------------------------------------------------------- main
if __name__ == "__main__":
    n_src_vocab, len_max_seq = 50, 16
    d_word_vec = d_model = 32           # hidden_size H = 3 * d_model = 96
    n_layers, n_head, d_k = 2, 4, 8     # n_head * d_k = 32, 4 ring windows -> 128 lanes
    d_inner = 64
    B, L = 2, 8

    key = jax.random.PRNGKey(0)
    pkey, dkey = jax.random.split(key)
    params = init_params(pkey, n_src_vocab, d_word_vec, n_layers, n_head, d_k, d_inner,
                         len_max_seq)

    # padded batch of instruction triples (opcode, operand, operand)
    tok = jax.random.randint(dkey, (B, L, 3), 2, n_src_vocab, dtype=jnp.int32)
    pad_vec = jnp.array([MASK_ID, EMPTY_OPRA_ID, EMPTY_OPRA_ID], dtype=jnp.int32)
    lengths = jnp.array([8, 5])                                # second sequence has 3 padded slots
    is_pad = jnp.arange(L)[None, :, None] >= lengths[:, None, None]
    src_seq = jnp.where(is_pad, pad_vec[None, None, :], tok)   # (B, L, 3)

    nodes, relay = forward(src_seq, params, n_head, d_k, d_word_vec)
    nodes, relay = jax.block_until_ready((nodes, relay))

    H = 3 * d_word_vec
    assert nodes.shape == (B, L, H) and relay.shape == (B, H)
    assert bool(jnp.all(jnp.isfinite(nodes))) and bool(jnp.all(jnp.isfinite(relay)))
    # padded node positions must be zeroed (masked_fill_)
    assert float(jnp.max(jnp.abs(nodes[1, 5:]))) == 0.0

    # numerical check against a plain-numpy (f64) transcription of the PyTorch forward,
    # using the same bf16-stored weights; tolerance covers the bf16 activation casts only.
    ref_nodes, ref_relay = reference_forward(src_seq, params, n_head, d_k, d_word_vec, d_inner)
    np.testing.assert_allclose(np.asarray(nodes), ref_nodes, rtol=5e-2, atol=5e-2)
    np.testing.assert_allclose(np.asarray(relay), ref_relay, rtol=5e-2, atol=5e-2)
    print("KERNEL_OK")
</pallas_src>

<mosaic_0001>
module attributes {stable_mosaic.version = 11 : i64} {
  func.func @_fused_star_kernel(%arg0: i32, %arg1: memref<16x128xf32, #tpu.memory_space<vmem>>, %arg2: memref<16x1xf32, #tpu.memory_space<vmem>>, %arg3: memref<16x1xf32, #tpu.memory_space<vmem>>, %arg4: memref<16x1xf32, #tpu.memory_space<vmem>>, %arg5: memref<16x2xf32, #tpu.memory_space<vmem>>, %arg6: memref<128x128xbf16, #tpu.memory_space<vmem>>, %arg7: memref<4x128x128xbf16, #tpu.memory_space<vmem>>, %arg8: memref<2x32x128xbf16, #tpu.memory_space<vmem>>, %arg9: memref<16x128xf32, #tpu.memory_space<vmem>>, %arg10: memref<16x128xf32, #tpu.memory_space<vmem>>, %arg11: memref<8x128xf32, #tpu.memory_space<vmem>>, %arg12: memref<16x128xf32, #tpu.memory_space<vmem>>) attributes {dimension_semantics = [#tpu.dimension_semantics<arbitrary>], iteration_bounds = array<i64: 2>, scalar_prefetch = 0 : i64, scratch_operands = 1 : i64, tpu.core_type = #tpu.core_type<tc>, window_params = [{pipeline_mode = #tpu.pipeline_mode<synchronous>, transform_indices = @transform_0, window_bounds = array<i64: 16, 128>}, {pipeline_mode = #tpu.pipeline_mode<synchronous>, transform_indices = @transform_1, window_bounds = array<i64: 16, 1>}, {pipeline_mode = #tpu.pipeline_mode<synchronous>, transform_indices = @transform_2, window_bounds = array<i64: 16, 1>}, {pipeline_mode = #tpu.pipeline_mode<synchronous>, transform_indices = @transform_3, window_bounds = array<i64: 16, 1>}, {pipeline_mode = #tpu.pipeline_mode<synchronous>, transform_indices = @transform_4, window_bounds = array<i64: 16, 2>}, {pipeline_mode = #tpu.pipeline_mode<synchronous>, transform_indices = @transform_5, window_bounds = array<i64: 128, 128>}, {transform_indices = @transform_6, window_bounds = array<i64: 4, 128, 128>}, {transform_indices = @transform_7, window_bounds = array<i64: 2, 32, 128>}, {transform_indices = @transform_8, window_bounds = array<i64: 16, 128>}, {pipeline_mode = #tpu.pipeline_mode<synchronous>, transform_indices = @transform_9, window_bounds = array<i64: 16, 128>}, {pipeline_mode = #tpu.pipeline_mode<synchronous>, transform_indices = @transform_10, window_bounds = array<i64: 8, 128>}]} {
    %0 = tpu.iota {dimensions = array<i32: 1>} : vector<1x128xi32>
    %c96_i32 = arith.constant 96 : i32
    %1 = vector.broadcast %c96_i32 : i32 to vector<1x128xi32>
    %2 = arith.cmpi slt, %0, %1 : vector<1x128xi32>
    %3 = arith.extui %2 : vector<1x128xi1> to vector<1x128xi32>
    %4 = arith.sitofp %3 : vector<1x128xi32> to vector<1x128xf32>
    %c0 = arith.constant 0 : index
    %c0_0 = arith.constant 0 : index
    %5 = vector.load %arg9[%c0, %c0_0] : memref<16x128xf32, #tpu.memory_space<vmem>>, vector<16x128xf32>
    %c0_i32 = arith.constant 0 : i32
    %6 = arith.cmpi eq, %arg0, %c0_i32 : i32
    %7 = arith.extui %6 : i1 to i32
    %c0_i32_1 = arith.constant 0 : i32
    %8 = arith.cmpi ne, %7, %c0_i32_1 : i32
    scf.if %8 {
      %c0_79 = arith.constant 0 : index
      %c0_80 = arith.constant 0 : index
      %234 = vector.load %arg1[%c0_79, %c0_80] : memref<16x128xf32, #tpu.memory_space<vmem>>, vector<16x128xf32>
      %c0_81 = arith.constant 0 : index
      %c0_82 = arith.constant 0 : index
      %235 = vector.load %arg10[%c0_81, %c0_82] : memref<16x128xf32, #tpu.memory_space<vmem>>, vector<16x128xf32>
      tpu.vector_store %arg10[%c0_81, %c0_82], %234 {strides = array<i32>} : memref<16x128xf32, #tpu.memory_space<vmem>>, vector<16x128xf32>,
      %cst_83 = arith.constant 0.000000e+00 : f32
      %236 = vector.broadcast %cst_83 : f32 to vector<8x128xf32>
      %c0_84 = arith.constant 0 : index
      %c0_85 = arith.constant 0 : index
      %237 = vector.load %arg11[%c0_84, %c0_85] : memref<8x128xf32, #tpu.memory_space<vmem>>, vector<8x128xf32>
      tpu.vector_store %arg11[%c0_84, %c0_85], %236 {strides = array<i32>} : memref<8x128xf32, #tpu.memory_space<vmem>>, vector<8x128xf32>,
      %238 = vector.shape_cast %234 : vector<16x128xf32> to vector<2x8x128xf32>
      %cst_86 = arith.constant dense<0.000000e+00> : vector<2x128xf32>
      %239 = vector.multi_reduction <add>, %238, %cst_86 [1] : vector<2x8x128xf32> to vector<2x128xf32>
      %cst_87 = arith.constant 8.000000e+00 : f32
      %240 = vector.broadcast %cst_87 : f32 to vector<2x128xf32>
      %241 = arith.divf %239, %240 : vector<2x128xf32>
      %c0_88 = arith.constant 0 : index
      %c0_89 = arith.constant 0 : index
      %242 = vector.load %arg11[%c0_88, %c0_89] : memref<8x128xf32, #tpu.memory_space<vmem>>, vector<2x128xf32>
      tpu.vector_store %arg11[%c0_88, %c0_89], %241 {strides = array<i32>} : memref<8x128xf32, #tpu.memory_space<vmem>>, vector<2x128xf32>,
    } else {
    }
    %c0_2 = arith.constant 0 : index
    %c0_3 = arith.constant 0 : index
    %9 = vector.load %arg10[%c0_2, %c0_3] : memref<16x128xf32, #tpu.memory_space<vmem>>, vector<16x128xf32>
    %c0_4 = arith.constant 0 : index
    %c0_5 = arith.constant 0 : index
    %10 = vector.load %arg11[%c0_4, %c0_5] : memref<8x128xf32, #tpu.memory_space<vmem>>, vector<8x128xf32>
    %c0_6 = arith.constant 0 : index
    %c0_7 = arith.constant 0 : index
    %11 = vector.load %arg2[%c0_6, %c0_7] : memref<16x1xf32, #tpu.memory_space<vmem>>, vector<16x1xf32>
    %c0_8 = arith.constant 0 : index
    %c0_9 = arith.constant 0 : index
    %12 = vector.load %arg3[%c0_8, %c0_9] : memref<16x1xf32, #tpu.memory_space<vmem>>, vector<16x1xf32>
    %c0_10 = arith.constant 0 : index
    %c0_11 = arith.constant 0 : index
    %13 = vector.load %arg4[%c0_10, %c0_11] : memref<16x1xf32, #tpu.memory_space<vmem>>, vector<16x1xf32>
    %c0_12 = arith.constant 0 : index
    %c0_13 = arith.constant 0 : index
    %14 = vector.load %arg6[%c0_12, %c0_13] : memref<128x128xbf16, #tpu.memory_space<vmem>>, vector<128x128xbf16>
    %c0_14 = arith.constant 0 : index
    %c0_15 = arith.constant 0 : index
    %c0_16 = arith.constant 0 : index
    %15 = vector.load %arg7[%c0_14, %c0_15, %c0_16] : memref<4x128x128xbf16, #tpu.memory_space<vmem>>, vector<1x128x128xbf16>
    %16 = vector.shape_cast %15 : vector<1x128x128xbf16> to vector<128x128xbf16>
    %17 = arith.truncf %9 : vector<16x128xf32> to vector<16x128xbf16>
    %cst = arith.constant dense<0.000000e+00> : vector<16x128xf32>
    %18 = tpu.matmul %17, %16, %cst {dimension_numbers = #tpu.dot_dimension_numbers<[1], [0], [0], [1], [0, 0, 1, 1], [], []>} : vector<16x128xbf16>, vector<128x128xbf16>, vector<16x128xf32> -> vector<16x128xf32>
    %19 = vector.extract_strided_slice %5 {offsets = [0, 0], sizes = [1, 128], strides = [1, 1]} : vector<16x128xf32> to vector<1x128xf32>
    %20 = vector.broadcast %19 : vector<1x128xf32> to vector<16x128xf32>
    %21 = arith.addf %18, %20 : vector<16x128xf32>
    %cst_17 = arith.constant 0.000000e+00 : f32
    %22 = vector.broadcast %cst_17 : f32 to vector<16x128xf32>
    %23 = arith.maximumf %21, %22 : vector<16x128xf32>
    %c1 = arith.constant 1 : index
    %c0_18 = arith.constant 0 : index
    %c0_19 = arith.constant 0 : index
    %24 = vector.load %arg7[%c1, %c0_18, %c0_19] : memref<4x128x128xbf16, #tpu.memory_space<vmem>>, vector<1x128x128xbf16>
    %25 = vector.shape_cast %24 : vector<1x128x128xbf16> to vector<128x128xbf16>
    %26 = arith.truncf %23 : vector<16x128xf32> to vector<16x128xbf16>
    %cst_20 = arith.constant dense<0.000000e+00> : vector<16x128xf32>
    %27 = tpu.matmul %26, %25, %cst_20 {dimension_numbers = #tpu.dot_dimension_numbers<[1], [0], [0], [1], [0, 0, 1, 1], [], []>} : vector<16x128xbf16>, vector<128x128xbf16>, vector<16x128xf32> -> vector<16x128xf32>
    %28 = vector.extract_strided_slice %5 {offsets = [1, 0], sizes = [1, 128], strides = [1, 1]} : vector<16x128xf32> to vector<1x128xf32>
    %29 = vector.broadcast %28 : vector<1x128xf32> to vector<16x128xf32>
    %30 = arith.addf %27, %29 : vector<16x128xf32>
    %31 = arith.addf %30, %9 : vector<16x128xf32>
    %32 = vector.extract_strided_slice %5 {offsets = [2, 0], sizes = [1, 128], strides = [1, 1]} : vector<16x128xf32> to vector<1x128xf32>
    %33 = vector.extract_strided_slice %5 {offsets = [3, 0], sizes = [1, 128], strides = [1, 1]} : vector<16x128xf32> to vector<1x128xf32>
    %34 = vector.broadcast %4 : vector<1x128xf32> to vector<16x128xf32>
    %35 = arith.mulf %31, %34 : vector<16x128xf32>
    %cst_21 = arith.constant dense<0.000000e+00> : vector<16xf32>
    %36 = vector.multi_reduction <add>, %35, %cst_21 [1] : vector<16x128xf32> to vector<16xf32>
    %37 = vector.shape_cast %36 : vector<16xf32> to vector<16x1xf32>
    %cst_22 = arith.constant 0.010416667 : f32
    %38 = vector.broadcast %cst_22 : f32 to vector<16x1xf32>
    %39 = arith.mulf %37, %38 : vector<16x1xf32>
    %40 = vector.broadcast %39 : vector<16x1xf32> to vector<16x128xf32>
    %41 = arith.subf %35, %40 : vector<16x128xf32>
    %42 = vector.broadcast %4 : vector<1x128xf32> to vector<16x128xf32>
    %43 = arith.mulf %41, %42 : vector<16x128xf32>
    %44 = arith.mulf %43, %43 : vector<16x128xf32>
    %cst_23 = arith.constant dense<0.000000e+00> : vector<16xf32>
    %45 = vector.multi_reduction <add>, %44, %cst_23 [1] : vector<16x128xf32> to vector<16xf32>
    %46 = vector.shape_cast %45 : vector<16xf32> to vector<16x1xf32>
    %cst_24 = arith.constant 0.010416667 : f32
    %47 = vector.broadcast %cst_24 : f32 to vector<16x1xf32>
    %48 = arith.mulf %46, %47 : vector<16x1xf32>
    %cst_25 = arith.constant 9.99999974E-6 : f32
    %49 = vector.broadcast %cst_25 : f32 to vector<16x1xf32>
    %50 = arith.addf %48, %49 : vector<16x1xf32>
    %51 = math.rsqrt %50 : vector<16x1xf32>
    %52 = vector.broadcast %51 : vector<16x1xf32> to vector<16x128xf32>
    %53 = arith.mulf %43, %52 : vector<16x128xf32>
    %54 = vector.broadcast %32 : vector<1x128xf32> to vector<16x128xf32>
    %55 = arith.mulf %53, %54 : vector<16x128xf32>
    %56 = vector.broadcast %33 : vector<1x128xf32> to vector<16x128xf32>
    %57 = arith.addf %55, %56 : vector<16x128xf32>
    %58 = vector.broadcast %4 : vector<1x128xf32> to vector<16x128xf32>
    %59 = arith.mulf %57, %58 : vector<16x128xf32>
    %60 = tpu.concatenate %59, %10 in 0 : vector<16x128xf32>, vector<8x128xf32> -> vector<24x128xf32>
    %c2 = arith.constant 2 : index
    %c0_26 = arith.constant 0 : index
    %c0_27 = arith.constant 0 : index
    %61 = vector.load %arg7[%c2, %c0_26, %c0_27] : memref<4x128x128xbf16, #tpu.memory_space<vmem>>, vector<1x128x128xbf16>
    %62 = vector.shape_cast %61 : vector<1x128x128xbf16> to vector<128x128xbf16>
    %63 = arith.truncf %60 : vector<24x128xf32> to vector<24x128xbf16>
    %cst_28 = arith.constant dense<0.000000e+00> : vector<24x128xf32>
    %64 = tpu.matmul %63, %62, %cst_28 {dimension_numbers = #tpu.dot_dimension_numbers<[1], [0], [0], [1], [0, 0, 1, 1], [], []>} : vector<24x128xbf16>, vector<128x128xbf16>, vector<24x128xf32> -> vector<24x128xf32>
    %65 = vector.extract_strided_slice %5 {offsets = [4, 0], sizes = [1, 128], strides = [1, 1]} : vector<16x128xf32> to vector<1x128xf32>
    %66 = vector.broadcast %65 : vector<1x128xf32> to vector<24x128xf32>
    %67 = arith.addf %64, %66 : vector<24x128xf32>
    %68 = vector.extract_strided_slice %67 {offsets = [0, 0], sizes = [16, 32], strides = [1, 1]} : vector<24x128xf32> to vector<16x32xf32>
    %69 = vector.extract_strided_slice %67 {offsets = [0, 32], sizes = [16, 64], strides = [1, 1]} : vector<24x128xf32> to vector<16x64xf32>
    %70 = vector.extract_strided_slice %67 {offsets = [16, 32], sizes = [2, 64], strides = [1, 1]} : vector<24x128xf32> to vector<2x64xf32>
    %c0_29 = arith.constant 0 : index
    %c0_30 = arith.constant 0 : index
    %71 = vector.load %arg5[%c0_29, %c0_30] : memref<16x2xf32, #tpu.memory_space<vmem>>, vector<16x2xf32>
    %cst_31 = arith.constant dense<0.000000e+00> : vector<16x64xf32>
    %72 = tpu.matmul %71, %70, %cst_31 {dimension_numbers = #tpu.dot_dimension_numbers<[1], [0], [0], [1], [0, 0, 1, 1], [], []>} : vector<16x2xf32>, vector<2x64xf32>, vector<16x64xf32> -> vector<16x64xf32>
    %c1_i32 = arith.constant 1 : i32
    %73 = tpu.dynamic_rotate %69 by %c1_i32 dim 0 : vector<16x64xf32>, i32 -> vector<16x64xf32>
    %74 = vector.broadcast %12 : vector<16x1xf32> to vector<16x64xf32>
    %75 = arith.mulf %73, %74 : vector<16x64xf32>
    %c15_i32 = arith.constant 15 : i32
    %76 = tpu.dynamic_rotate %69 by %c15_i32 dim 0 : vector<16x64xf32>, i32 -> vector<16x64xf32>
    %77 = vector.broadcast %13 : vector<16x1xf32> to vector<16x64xf32>
    %78 = arith.mulf %76, %77 : vector<16x64xf32>
    %79 = vector.extract_strided_slice %75 {offsets = [0, 0], sizes = [16, 32], strides = [1, 1]} : vector<16x64xf32> to vector<16x32xf32>
    %80 = arith.mulf %68, %79 : vector<16x32xf32>
    %c0_32 = arith.constant 0 : index
    %c0_33 = arith.constant 0 : index
    %81 = vector.load %arg12[%c0_32, %c0_33] : memref<16x128xf32, #tpu.memory_space<vmem>>, vector<16x32xf32>
    tpu.vector_store %arg12[%c0_32, %c0_33], %80 {strides = array<i32>} : memref<16x128xf32, #tpu.memory_space<vmem>>, vector<16x32xf32>,
    %82 = vector.extract_strided_slice %69 {offsets = [0, 0], sizes = [16, 32], strides = [1, 1]} : vector<16x64xf32> to vector<16x32xf32>
    %83 = arith.mulf %68, %82 : vector<16x32xf32>
    %c0_34 = arith.constant 0 : index
    %c32 = arith.constant 32 : index
    %84 = vector.load %arg12[%c0_34, %c32] : memref<16x128xf32, #tpu.memory_space<vmem>>, vector<16x32xf32>
    tpu.vector_store %arg12[%c0_34, %c32], %83 {strides = array<i32>} : memref<16x128xf32, #tpu.memory_space<vmem>>, vector<16x32xf32>,
    %85 = vector.extract_strided_slice %78 {offsets = [0, 0], sizes = [16, 32], strides = [1, 1]} : vector<16x64xf32> to vector<16x32xf32>
    %86 = arith.mulf %68, %85 : vector<16x32xf32>
    %c0_35 = arith.constant 0 : index
    %c64 = arith.constant 64 : index
    %87 = vector.load %arg12[%c0_35, %c64] : memref<16x128xf32, #tpu.memory_space<vmem>>, vector<16x32xf32>
    tpu.vector_store %arg12[%c0_35, %c64], %86 {strides = array<i32>} : memref<16x128xf32, #tpu.memory_space<vmem>>, vector<16x32xf32>,
    %88 = vector.extract_strided_slice %72 {offsets = [0, 0], sizes = [16, 32], strides = [1, 1]} : vector<16x64xf32> to vector<16x32xf32>
    %89 = arith.mulf %68, %88 : vector<16x32xf32>
    %c0_36 = arith.constant 0 : index
    %c96 = arith.constant 96 : index
    %90 = vector.load %arg12[%c0_36, %c96] : memref<16x128xf32, #tpu.memory_space<vmem>>, vector<16x32xf32>
    tpu.vector_store %arg12[%c0_36, %c96], %89 {strides = array<i32>} : memref<16x128xf32, #tpu.memory_space<vmem>>, vector<16x32xf32>,
    %c0_37 = arith.constant 0 : index
    %c0_38 = arith.constant 0 : index
    %91 = vector.load %arg12[%c0_37, %c0_38] : memref<16x128xf32, #tpu.memory_space<vmem>>, vector<16x128xf32>
    %92 = arith.truncf %91 : vector<16x128xf32> to vector<16x128xbf16>
    %cst_39 = arith.constant dense<0.000000e+00> : vector<16x128xf32>
    %93 = tpu.matmul %92, %14, %cst_39 {dimension_numbers = #tpu.dot_dimension_numbers<[1], [0], [0], [1], [0, 0, 1, 1], [], []>} : vector<16x128xbf16>, vector<128x128xbf16>, vector<16x128xf32> -> vector<16x128xf32>
    %cst_40 = arith.constant 0.353553385 : f32
    %94 = vector.broadcast %cst_40 : f32 to vector<16x128xf32>
    %95 = arith.mulf %93, %94 : vector<16x128xf32>
    %96 = vector.extract_strided_slice %95 {offsets = [0, 0], sizes = [16, 32], strides = [1, 1]} : vector<16x128xf32> to vector<16x32xf32>
    %97 = vector.extract_strided_slice %95 {offsets = [0, 32], sizes = [16, 32], strides = [1, 1]} : vector<16x128xf32> to vector<16x32xf32>
    %98 = vector.extract_strided_slice %95 {offsets = [0, 64], sizes = [16, 32], strides = [1, 1]} : vector<16x128xf32> to vector<16x32xf32>
    %99 = vector.extract_strided_slice %95 {offsets = [0, 96], sizes = [16, 32], strides = [1, 1]} : vector<16x128xf32> to vector<16x32xf32>
    %100 = arith.maximumf %96, %97 : vector<16x32xf32>
    %101 = arith.maximumf %98, %99 : vector<16x32xf32>
    %102 = arith.maximumf %100, %101 : vector<16x32xf32>
    %103 = arith.subf %96, %102 : vector<16x32xf32>
    %104 = math.exp %103 : vector<16x32xf32>
    %105 = arith.subf %97, %102 : vector<16x32xf32>
    %106 = math.exp %105 : vector<16x32xf32>
    %107 = arith.subf %98, %102 : vector<16x32xf32>
    %108 = math.exp %107 : vector<16x32xf32>
    %109 = arith.subf %99, %102 : vector<16x32xf32>
    %110 = math.exp %109 : vector<16x32xf32>
    %111 = arith.addf %104, %106 : vector<16x32xf32>
    %112 = arith.addf %111, %108 : vector<16x32xf32>
    %113 = arith.addf %112, %110 : vector<16x32xf32>
    %cst_41 = arith.constant 1.000000e+00 : f32
    %114 = vector.broadcast %cst_41 : f32 to vector<16x32xf32>
    %115 = arith.divf %114, %113 : vector<16x32xf32>
    %116 = vector.extract_strided_slice %75 {offsets = [0, 32], sizes = [16, 32], strides = [1, 1]} : vector<16x64xf32> to vector<16x32xf32>
    %117 = arith.mulf %104, %116 : vector<16x32xf32>
    %118 = vector.extract_strided_slice %69 {offsets = [0, 32], sizes = [16, 32], strides = [1, 1]} : vector<16x64xf32> to vector<16x32xf32>
    %119 = arith.mulf %106, %118 : vector<16x32xf32>
    %120 = arith.addf %117, %119 : vector<16x32xf32>
    %121 = vector.extract_strided_slice %78 {offsets = [0, 32], sizes = [16, 32], strides = [1, 1]} : vector<16x64xf32> to vector<16x32xf32>
    %122 = arith.mulf %108, %121 : vector<16x32xf32>
    %123 = arith.addf %120, %122 : vector<16x32xf32>
    %124 = vector.extract_strided_slice %72 {offsets = [0, 32], sizes = [16, 32], strides = [1, 1]} : vector<16x64xf32> to vector<16x32xf32>
    %125 = arith.mulf %110, %124 : vector<16x32xf32>
    %126 = arith.addf %123, %125 : vector<16x32xf32>
    %127 = arith.mulf %126, %115 : vector<16x32xf32>
    %c0_42 = arith.constant 0 : index
    %c0_43 = arith.constant 0 : index
    %c0_44 = arith.constant 0 : index
    %128 = vector.load %arg8[%c0_42, %c0_43, %c0_44] : memref<2x32x128xbf16, #tpu.memory_space<vmem>>, vector<1x32x128xbf16>
    %129 = vector.shape_cast %128 : vector<1x32x128xbf16> to vector<32x128xbf16>
    %130 = arith.truncf %127 : vector<16x32xf32> to vector<16x32xbf16>
    %cst_45 = arith.constant dense<0.000000e+00> : vector<16x128xf32>
    %131 = tpu.matmul %130, %129, %cst_45 {dimension_numbers = #tpu.dot_dimension_numbers<[1], [0], [0], [1], [0, 0, 1, 1], [], []>} : vector<16x32xbf16>, vector<32x128xbf16>, vector<16x128xf32> -> vector<16x128xf32>
    %132 = vector.extract_strided_slice %5 {offsets = [5, 0], sizes = [1, 128], strides = [1, 1]} : vector<16x128xf32> to vector<1x128xf32>
    %133 = vector.broadcast %132 : vector<1x128xf32> to vector<16x128xf32>
    %134 = arith.addf %131, %133 : vector<16x128xf32>
    %135 = vector.extract_strided_slice %5 {offsets = [6, 0], sizes = [1, 128], strides = [1, 1]} : vector<16x128xf32> to vector<1x128xf32>
    %136 = vector.extract_strided_slice %5 {offsets = [7, 0], sizes = [1, 128], strides = [1, 1]} : vector<16x128xf32> to vector<1x128xf32>
    %137 = vector.broadcast %4 : vector<1x128xf32> to vector<16x128xf32>
    %138 = arith.mulf %134, %137 : vector<16x128xf32>
    %cst_46 = arith.constant dense<0.000000e+00> : vector<16xf32>
    %139 = vector.multi_reduction <add>, %138, %cst_46 [1] : vector<16x128xf32> to vector<16xf32>
    %140 = vector.shape_cast %139 : vector<16xf32> to vector<16x1xf32>
    %cst_47 = arith.constant 0.010416667 : f32
    %141 = vector.broadcast %cst_47 : f32 to vector<16x1xf32>
    %142 = arith.mulf %140, %141 : vector<16x1xf32>
    %143 = vector.broadcast %142 : vector<16x1xf32> to vector<16x128xf32>
    %144 = arith.subf %138, %143 : vector<16x128xf32>
    %145 = vector.broadcast %4 : vector<1x128xf32> to vector<16x128xf32>
    %146 = arith.mulf %144, %145 : vector<16x128xf32>
    %147 = arith.mulf %146, %146 : vector<16x128xf32>
    %cst_48 = arith.constant dense<0.000000e+00> : vector<16xf32>
    %148 = vector.multi_reduction <add>, %147, %cst_48 [1] : vector<16x128xf32> to vector<16xf32>
    %149 = vector.shape_cast %148 : vector<16xf32> to vector<16x1xf32>
    %cst_49 = arith.constant 0.010416667 : f32
    %150 = vector.broadcast %cst_49 : f32 to vector<16x1xf32>
    %151 = arith.mulf %149, %150 : vector<16x1xf32>
    %cst_50 = arith.constant 9.99999974E-6 : f32
    %152 = vector.broadcast %cst_50 : f32 to vector<16x1xf32>
    %153 = arith.addf %151, %152 : vector<16x1xf32>
    %154 = math.rsqrt %153 : vector<16x1xf32>
    %155 = vector.broadcast %154 : vector<16x1xf32> to vector<16x128xf32>
    %156 = arith.mulf %146, %155 : vector<16x128xf32>
    %157 = vector.broadcast %135 : vector<1x128xf32> to vector<16x128xf32>
    %158 = arith.mulf %156, %157 : vector<16x128xf32>
    %159 = vector.broadcast %136 : vector<1x128xf32> to vector<16x128xf32>
    %160 = arith.addf %158, %159 : vector<16x128xf32>
    %161 = vector.broadcast %4 : vector<1x128xf32> to vector<16x128xf32>
    %162 = arith.mulf %160, %161 : vector<16x128xf32>
    %cst_51 = arith.constant 0.000000e+00 : f32
    %163 = vector.broadcast %cst_51 : f32 to vector<16x128xf32>
    %164 = arith.cmpf oge, %162, %163 : vector<16x128xf32>
    %cst_52 = arith.constant 0.00999999977 : f32
    %165 = vector.broadcast %cst_52 : f32 to vector<16x128xf32>
    %166 = arith.mulf %165, %162 : vector<16x128xf32>
    %167 = arith.select %164, %162, %166 : vector<16x128xi1>, vector<16x128xf32>
    %168 = tpu.concatenate %167, %10 in 0 : vector<16x128xf32>, vector<8x128xf32> -> vector<24x128xf32>
    %c3 = arith.constant 3 : index
    %c0_53 = arith.constant 0 : index
    %c0_54 = arith.constant 0 : index
    %169 = vector.load %arg7[%c3, %c0_53, %c0_54] : memref<4x128x128xbf16, #tpu.memory_space<vmem>>, vector<1x128x128xbf16>
    %170 = vector.shape_cast %169 : vector<1x128x128xbf16> to vector<128x128xbf16>
    %171 = arith.truncf %168 : vector<24x128xf32> to vector<24x128xbf16>
    %cst_55 = arith.constant dense<0.000000e+00> : vector<24x128xf32>
    %172 = tpu.matmul %171, %170, %cst_55 {dimension_numbers = #tpu.dot_dimension_numbers<[1], [0], [0], [1], [0, 0, 1, 1], [], []>} : vector<24x128xbf16>, vector<128x128xbf16>, vector<24x128xf32> -> vector<24x128xf32>
    %173 = vector.extract_strided_slice %5 {offsets = [8, 0], sizes = [1, 128], strides = [1, 1]} : vector<16x128xf32> to vector<1x128xf32>
    %174 = vector.broadcast %173 : vector<1x128xf32> to vector<24x128xf32>
    %175 = arith.addf %172, %174 : vector<24x128xf32>
    %176 = vector.extract_strided_slice %175 {offsets = [0, 32], sizes = [16, 32], strides = [1, 1]} : vector<24x128xf32> to vector<16x32xf32>
    %177 = vector.extract_strided_slice %175 {offsets = [0, 64], sizes = [16, 32], strides = [1, 1]} : vector<24x128xf32> to vector<16x32xf32>
    %178 = vector.extract_strided_slice %175 {offsets = [16, 0], sizes = [2, 32], strides = [1, 1]} : vector<24x128xf32> to vector<2x32xf32>
    %179 = vector.extract_strided_slice %175 {offsets = [16, 64], sizes = [2, 32], strides = [1, 1]} : vector<24x128xf32> to vector<2x32xf32>
    %c0_56 = arith.constant 0 : index
    %c0_57 = arith.constant 0 : index
    %180 = vector.load %arg5[%c0_56, %c0_57] : memref<16x2xf32, #tpu.memory_space<vmem>>, vector<16x2xf32>
    %cst_58 = arith.constant dense<0.000000e+00> : vector<16x32xf32>
    %181 = tpu.matmul %180, %178, %cst_58 {dimension_numbers = #tpu.dot_dimension_numbers<[1], [0], [0], [1], [0, 0, 1, 1], [], []>} : vector<16x2xf32>, vector<2x32xf32>, vector<16x32xf32> -> vector<16x32xf32>
    %182 = arith.mulf %181, %176 : vector<16x32xf32>
    %183 = vector.extract_strided_slice %175 {offsets = [16, 0], sizes = [8, 32], strides = [1, 1]} : vector<24x128xf32> to vector<8x32xf32>
    %184 = vector.extract_strided_slice %175 {offsets = [16, 32], sizes = [8, 32], strides = [1, 1]} : vector<24x128xf32> to vector<8x32xf32>
    %185 = arith.mulf %183, %184 : vector<8x32xf32>
    %186 = tpu.concatenate %182, %185 in 0 : vector<16x32xf32>, vector<8x32xf32> -> vector<24x32xf32>
    %187 = vector.extract_strided_slice %14 {offsets = [0, 0], sizes = [32, 32], strides = [1, 1]} : vector<128x128xbf16> to vector<32x32xbf16>
    %188 = arith.truncf %186 : vector<24x32xf32> to vector<24x32xbf16>
    %cst_59 = arith.constant dense<0.000000e+00> : vector<24x32xf32>
    %189 = tpu.matmul %188, %187, %cst_59 {dimension_numbers = #tpu.dot_dimension_numbers<[1], [0], [0], [1], [0, 0, 1, 1], [], []>} : vector<24x32xbf16>, vector<32x32xbf16>, vector<24x32xf32> -> vector<24x32xf32>
    %cst_60 = arith.constant 0.353553385 : f32
    %190 = vector.broadcast %cst_60 : f32 to vector<24x32xf32>
    %191 = arith.mulf %189, %190 : vector<24x32xf32>
    %192 = vector.extract_strided_slice %191 {offsets = [0, 0], sizes = [16, 32], strides = [1, 1]} : vector<24x32xf32> to vector<16x32xf32>
    %cst_61 = arith.constant 1.000000e+00 : f32
    %193 = vector.broadcast %cst_61 : f32 to vector<16x1xf32>
    %194 = arith.subf %11, %193 : vector<16x1xf32>
    %cst_62 = arith.constant 1.000000e+30 : f32
    %195 = vector.broadcast %cst_62 : f32 to vector<16x1xf32>
    %196 = arith.mulf %194, %195 : vector<16x1xf32>
    %197 = vector.broadcast %196 : vector<16x1xf32> to vector<16x32xf32>
    %198 = arith.addf %192, %197 : vector<16x32xf32>
    %199 = vector.extract_strided_slice %191 {offsets = [16, 0], sizes = [2, 32], strides = [1, 1]} : vector<24x32xf32> to vector<2x32xf32>
    %200 = vector.shape_cast %198 : vector<16x32xf32> to vector<2x8x32xf32>
    %cst_63 = arith.constant dense<0xFF800000> : vector<2x32xf32>
    %201 = vector.multi_reduction <maximumf>, %200, %cst_63 [1] : vector<2x8x32xf32> to vector<2x32xf32>
    %202 = arith.maximumf %201, %199 : vector<2x32xf32>
    %c0_64 = arith.constant 0 : index
    %c0_65 = arith.constant 0 : index
    %203 = vector.load %arg5[%c0_64, %c0_65] : memref<16x2xf32, #tpu.memory_space<vmem>>, vector<16x2xf32>
    %cst_66 = arith.constant dense<0.000000e+00> : vector<16x32xf32>
    %204 = tpu.matmul %203, %202, %cst_66 {dimension_numbers = #tpu.dot_dimension_numbers<[1], [0], [0], [1], [0, 0, 1, 1], [], []>} : vector<16x2xf32>, vector<2x32xf32>, vector<16x32xf32> -> vector<16x32xf32>
    %205 = arith.subf %198, %204 : vector<16x32xf32>
    %206 = math.exp %205 : vector<16x32xf32>
    %207 = arith.subf %199, %202 : vector<2x32xf32>
    %208 = math.exp %207 : vector<2x32xf32>
    %209 = vector.shape_cast %206 : vector<16x32xf32> to vector<2x8x32xf32>
    %cst_67 = arith.constant dense<0.000000e+00> : vector<2x32xf32>
    %210 = vector.multi_reduction <add>, %209, %cst_67 [1] : vector<2x8x32xf32> to vector<2x32xf32>
    %211 = arith.addf %208, %210 : vector<2x32xf32>
    %212 = arith.mulf %208, %179 : vector<2x32xf32>
    %213 = arith.mulf %206, %177 : vector<16x32xf32>
    %214 = vector.shape_cast %213 : vector<16x32xf32> to vector<2x8x32xf32>
    %cst_68 = arith.constant dense<0.000000e+00> : vector<2x32xf32>
    %215 = vector.multi_reduction <add>, %214, %cst_68 [1] : vector<2x8x32xf32> to vector<2x32xf32>
    %216 = arith.addf %212, %215 : vector<2x32xf32>
    %217 = arith.divf %216, %211 : vector<2x32xf32>
    %c1_69 = arith.constant 1 : index
    %c0_70 = arith.constant 0 : index
    %c0_71 = arith.constant 0 : index
    %218 = vector.load %arg8[%c1_69, %c0_70, %c0_71] : memref<2x32x128xbf16, #tpu.memory_space<vmem>>, vector<1x32x128xbf16>
    %219 = vector.shape_cast %218 : vector<1x32x128xbf16> to vector<32x128xbf16>
    %220 = arith.truncf %217 : vector<2x32xf32> to vector<2x32xbf16>
    %cst_72 = arith.constant dense<0.000000e+00> : vector<2x128xf32>
    %221 = tpu.matmul %220, %219, %cst_72 {dimension_numbers = #tpu.dot_dimension_numbers<[1], [0], [0], [1], [0, 0, 1, 1], [], []>} : vector<2x32xbf16>, vector<32x128xbf16>, vector<2x128xf32> -> vector<2x128xf32>
    %222 = vector.extract_strided_slice %5 {offsets = [9, 0], sizes = [1, 128], strides = [1, 1]} : vector<16x128xf32> to vector<1x128xf32>
    %223 = vector.broadcast %222 : vector<1x128xf32> to vector<2x128xf32>
    %224 = arith.addf %221, %223 : vector<2x128xf32>
    %cst_73 = arith.constant 0.000000e+00 : f32
    %225 = vector.broadcast %cst_73 : f32 to vector<2x128xf32>
    %226 = arith.cmpf oge, %224, %225 : vector<2x128xf32>
    %cst_74 = arith.constant 0.00999999977 : f32
    %227 = vector.broadcast %cst_74 : f32 to vector<2x128xf32>
    %228 = arith.mulf %227, %224 : vector<2x128xf32>
    %229 = arith.select %226, %224, %228 : vector<2x128xi1>, vector<2x128xf32>
    %230 = vector.broadcast %11 : vector<16x1xf32> to vector<16x128xf32>
    %231 = arith.mulf %167, %230 : vector<16x128xf32>
    %c0_75 = arith.constant 0 : index
    %c0_76 = arith.constant 0 : index
    %232 = vector.load %arg10[%c0_75, %c0_76] : memref<16x128xf32, #tpu.memory_space<vmem>>, vector<16x128xf32>
    tpu.vector_store %arg10[%c0_75, %c0_76], %231 {strides = array<i32>} : memref<16x128xf32, #tpu.memory_space<vmem>>, vector<16x128xf32>,
    %c0_77 = arith.constant 0 : index
    %c0_78 = arith.constant 0 : index
    %233 = vector.load %arg11[%c0_77, %c0_78] : memref<8x128xf32, #tpu.memory_space<vmem>>, vector<2x128xf32>
    tpu.vector_store %arg11[%c0_77, %c0_78], %229 {strides = array<i32>} : memref<8x128xf32, #tpu.memory_space<vmem>>, vector<2x128xf32>,
    return
  }
  func.func @transform_0(%arg0: i32) -> (i32, i32) {
    %c0_i32 = arith.constant 0 : i32
    %c0_i32_0 = arith.constant 0 : i32
    %c0_i32_1 = arith.constant 0 : i32
    return %c0_i32, %c0_i32_0 : i32, i32
  }
  func.func @transform_1(%arg0: i32) -> (i32, i32) {
    %c0_i32 = arith.constant 0 : i32
    %c0_i32_0 = arith.constant 0 : i32
    %c0_i32_1 = arith.constant 0 : i32
    return %c0_i32, %c0_i32_0 : i32, i32
  }
  func.func @transform_2(%arg0: i32) -> (i32, i32) {
    %c0_i32 = arith.constant 0 : i32
    %c0_i32_0 = arith.constant 0 : i32
    %c0_i32_1 = arith.constant 0 : i32
    return %c0_i32, %c0_i32_0 : i32, i32
  }
  func.func @transform_3(%arg0: i32) -> (i32, i32) {
    %c0_i32 = arith.constant 0 : i32
    %c0_i32_0 = arith.constant 0 : i32
    %c0_i32_1 = arith.constant 0 : i32
    return %c0_i32, %c0_i32_0 : i32, i32
  }
  func.func @transform_4(%arg0: i32) -> (i32, i32) {
    %c0_i32 = arith.constant 0 : i32
    %c0_i32_0 = arith.constant 0 : i32
    %c0_i32_1 = arith.constant 0 : i32
    return %c0_i32, %c0_i32_0 : i32, i32
  }
  func.func @transform_5(%arg0: i32) -> (i32, i32) {
    %c0_i32 = arith.constant 0 : i32
    %c0_i32_0 = arith.constant 0 : i32
    %c0_i32_1 = arith.constant 0 : i32
    return %c0_i32, %c0_i32_0 : i32, i32
  }
  func.func @transform_6(%arg0: i32) -> (i32, i32, i32) {
    %c0_i32 = arith.constant 0 : i32
    %c0_i32_0 = arith.constant 0 : i32
    %c0_i32_1 = arith.constant 0 : i32
    return %arg0, %c0_i32, %c0_i32_0 : i32, i32, i32
  }
  func.func @transform_7(%arg0: i32) -> (i32, i32, i32) {
    %c0_i32 = arith.constant 0 : i32
    %c0_i32_0 = arith.constant 0 : i32
    %c0_i32_1 = arith.constant 0 : i32
    return %arg0, %c0_i32, %c0_i32_0 : i32, i32, i32
  }
  func.func @transform_8(%arg0: i32) -> (i32, i32) {
    %c0_i32 = arith.constant 0 : i32
    %c0_i32_0 = arith.constant 0 : i32
    return %arg0, %c0_i32 : i32, i32
  }
  func.func @transform_9(%arg0: i32) -> (i32, i32) {
    %c0_i32 = arith.constant 0 : i32
    %c0_i32_0 = arith.constant 0 : i32
    %c0_i32_1 = arith.constant 0 : i32
    return %c0_i32, %c0_i32_0 : i32, i32
  }
  func.func @transform_10(%arg0: i32) -> (i32, i32) {
    %c0_i32 = arith.constant 0 : i32
    %c0_i32_0 = arith.constant 0 : i32
    %c0_i32_1 = arith.constant 0 : i32
    return %c0_i32, %c0_i32_0 : i32, i32
  }
}

</mosaic_0001>

<bundles_post_ra>
// kernel: tpu_custom_call.1
= control target key start
LH: loop header
LB: loop body
LE: loop exit
PB: predicated region body
PF: predicated region fallthrough
CT: control target
= control target key end

     0   :  { %s2905_s0 = inlined_call_operand.vmem [shape: f32[16,128], index: 0, kind: input, shape index: {}]   ;;  %s2906_s1 = inlined_call_operand.vmem [shape: f32[16,1], index: 1, kind: input, shape index: {}]   ;;  %s2907_s2 = inlined_call_operand.vmem [shape: f32[16,1], index: 2, kind: input, shape index: {}]   ;;  %s2908_s3 = inlined_call_operand.vmem [shape: f32[16,1], index: 3, kind: input, shape index: {}]   ;;  %s2909_s4 = inlined_call_operand.vmem [shape: f32[16,2], index: 4, kind: input, shape index: {}]   ;;  %s2910_s5 = inlined_call_operand.hbm [shape: bf16[128,128], index: 5, kind: input, shape index: {}]   ;;  %s2911_s6 = inlined_call_operand.hbm [shape: bf16[8,128,128], index: 6, kind: input, shape index: {}]   ;;  %s2912_s7 = inlined_call_operand.hbm [shape: bf16[4,32,128], index: 7, kind: input, shape index: {}]   ;;  %s2913_s8 = inlined_call_operand.vmem [shape: f32[32,128], index: 8, kind: input, shape index: {}]   ;;  %s2914_s9 = inlined_call_operand.hbm [shape: f32[16,128], index: 9, kind: output, shape index: {0}]   ;;  %s2915_s10 = inlined_call_operand.hbm [shape: f32[8,128], index: 10, kind: output, shape index: {1}]  }
   0x1   :  { %2919 = sst [smem:[#allocation18_spill]] %s2910_s5 }
   0x2   :  { %16 = vsyncpa [#allocation4], 0 }
   0x3   :  { %17 = vsyncpa [#allocation7], 0 }
   0x4   :  { %19 = vsyncpa [#allocation7 + $0x1], 0 }
   0x5   :  { %20 = vsyncpa [#allocation5], 0 }
   0x6   :  { %21 = vsyncpa [#allocation11], 0  ;;  %s2481_s13 = smov 0   ;;  %s2483_s14 = smov 0  }
   0x7   :  { %s2485_s15 = smov 0   ;;  %s2487_s16 = smov 0  }
   0x8 LB: > { %2920 = sst [smem:[#allocation16_spill]] %s2406_s15  ;;  %s2502_s17 = sadd.s32 1, %s2410_s16   ;;  %s2410_s16 = sphi %s2487_s16, %s2933_s16   ;;  %s2406_s15 = sphi %s2485_s15, %s2930_s15   ;;  %s2402_s14 = sphi %s2483_s14, %s2932_s14   ;;  %s2398_s13 = sphi %s2481_s13, %s2931_s13  }
   0x9   : > { %s160_s18 = sadd.s32 1, %s2406_s15  ;;  %s157_s19 = ssub.s32 %s2410_s16, %s2502_s17 }
   0xa   : > { %p167_p0 = scmp.ne.s32.totalorder %s2406_s15, %s2402_s14  ;;  %p158_p1 = scmp.eq.s32.totalorder %s157_s19, 0 }
   0xb   : > { %p168_p2 = scmp.eq.s32.totalorder %s2410_s16, 0  ;;  %p2125_p4 = scmp.lt.s32.totalorder %s2410_s16, 2 }
   0xc   : > { %s2511_s20 = scalar_select %p158_p1, %s2406_s15, %s160_s18  }
   0xd   : > { %p169_p3 = por %p168_p2, %p167_p0  ;;  %s320_s21 = sand.u32 1, %s2410_s16  }
   0xe   : > { %2921 = sst [smem:[#allocation17_spill]] %s2511_s20  ;;  %s322_s22 = sand.u32 1, %s2406_s15  }
   0xf   : > { %s1784_s23 = sshll.u32 %s322_s22, 8  ;;  %s2050_s24 = sshll.u32 %s2410_s16, 8 }
  0x10   : > { %s330_s27 = scalar_lea.hbm %s2911_s6, %s2050_s24  ;;  %s324_s29 = scalar_lea.vmem [#allocation6], %s1784_s23 }
  0x11   : > { %s331_s28 = sshll.u32 %s330_s27, 4  ;;  %s333_s30 = sshll.u32 %s324_s29, 4  ;;  %s332_s28 = int_to_ptr.hbm [resolvable:$true] %s331_s28  ;;  %s334_s30 = int_to_ptr.vmem [resolvable:$true] %s333_s30 }
  0x12   : > { %p2520_p5 = pnand %p2125_p4, %p169_p3  ;;  %s1788_s12 = sshll.u32 %s322_s22, 5 }
  0x13   : > { %s347_s18 = scalar_lea.vmem [#allocation8], %s1788_s12  ;;  %s2526_s20 = scalar_lea.sflag [#allocation7], %s320_s21 }
  0x14   : > { %s2524_s19 = sshll.u32 %s347_s18, 4  ;;  %s2218_s15 = sshra.s32 %s332_s28, 4  ;;  %s2219_s15 = int_to_ptr.hbm [resolvable:$true] %s2218_s15  ;;  %s357_s19 = int_to_ptr.vmem [resolvable:$true] %s2524_s19 }
  0x15   : > { %s2220_s24 = scalar_lea.hbm %s2219_s15, 256  ;;  %p2222_p7 = pneg %p2520_p5 }
  0x16   : > { %p2221_p6 = scmp.ne.s32.totalorder %s2219_s15, %s2220_s24  ;;  %s2225_s26 = scalar_lea.hbm %s2911_s6, 512 }
  0x17   : > { %p2226_p10 = scmp.lt.s32.totalorder %s2219_s15, %s2911_s6  ;;  %p2227_p11 = scmp.lt.s32.totalorder %s2225_s26, %s2220_s24 }
  0x18   : > { %p2223_p8 = pnand %p2222_p7, %p2221_p6 }
  0x19   : > { %p2228_p12 = por %p2227_p11, %p2226_p10 }
  0x1a   : > { %p2224_p9 = pneg %p2223_p8 }
  0x1c   : > { %p2229_p13 = pnand %p2228_p12, %p2224_p9 }
  0x1e   : > { %2232 = shalt.err (!%p2229_p13)
}
  0x1f   : > { %s2917_s21 = smov 64   ;;  %s2413_s29 = smov 4  }
  0x20   : > { %2120 = dma.hbm_to_vmem [thread:$0]  (!%p2520_p5), %s332_s28, 4096, %s334_s30, %s2526_s20, %s2917_s21, %s2917_s21, %s2413_s29  }
  0x21   : > { %s2546_s15 = sadd.s32 4294967295, %s2410_s16   ;;  %p173_p0 = scmp.ne.s32.totalorder %s2402_s14, %s2398_s13 }
  0x22   : > { %p174_p1 = scmp.eq.s32.totalorder %s2546_s15, 0  ;;  %p1781_p2 = scmp.ge.s32.totalorder %s2410_s16, 1 }
  0x23   : > { %p278_p3 = scmp.lt.s32.totalorder %s2410_s16, 3  ;;  %p1782_p6 = scmp.ne.s32.totalorder %s2546_s15, 0 }
  0x24   : > { %p2555_p4 = por %p174_p1, %p173_p0  ;;  %s2925_s5 = sld [smem:[#allocation18_spill]] }
  0x25   : > { %p2560_p8 = pnand %p1781_p2, %p278_p3  ;;  %s2414_s13 = smov [#allocation3]  }
  0x26   : > { %s306_s23 = sshll.u32 %s2414_s13, 4  ;;  %s2052_s25 = sshll.u32 %s2410_s16, 5  ;;  %s307_s23 = int_to_ptr.vmem [resolvable:$true] %s306_s23 }
  0x27   : > { %p2113_p9 = pneg %p2560_p8  ;;  %s353_s27 = scalar_lea.hbm %s2912_s7, %s2052_s25 }
  0x28   : > { %s354_s21 = sshll.u32 %s353_s27, 4  ;;  %s2926_s28 = smov 64   ;;  %s355_s21 = int_to_ptr.hbm [resolvable:$true] %s354_s21 }
  0x29   : > { %p2114_p10 = pnand %p2113_p9, %p174_p1  ;;  %s2278_s30 = sshra.s32 %s355_s21, 4  ;;  %s2279_s30 = int_to_ptr.hbm [resolvable:$true] %s2278_s30 }
  0x2a   : > { %s304_s24 = sshll.u32 %s2925_s5, 4  ;;  %s2280_s5 = scalar_lea.hbm %s2279_s30, 32  ;;  %s305_s24 = int_to_ptr.hbm [resolvable:$true] %s304_s24 }
  0x2b   : > { %2116 = dma.hbm_to_vmem [thread:$0]  (!%p2114_p10), %s305_s24, 1024, %s307_s23, [#allocation4], %s2926_s28, %s2926_s28, %s2413_s29  }
  0x2c   : > { %p2281_p11 = scmp.ne.s32.totalorder %s2279_s30, %s2280_s5  ;;  %s2285_s26 = scalar_lea.hbm %s2912_s7, 64 }
  0x2d   : > { %p2286_p0 = scmp.lt.s32.totalorder %s2279_s30, %s2912_s7  ;;  %p2287_p2 = scmp.lt.s32.totalorder %s2285_s26, %s2280_s5 }
  0x2e   : > { %p2283_p12 = pnand %p2281_p11, %p2222_p7 }
  0x2f   : > { %p2288_p3 = por %p2287_p2, %p2286_p0 }
  0x30   : > { %p2284_p13 = pneg %p2283_p12 }
  0x32   : > { %p2289_p9 = pnand %p2288_p3, %p2284_p13 }
  0x34   : > { %2292 = shalt.err (!%p2289_p9)
}
  0x35   : > { %2123 = dma.hbm_to_vmem [thread:$0]  (!%p2520_p5), %s355_s21, 512, %s357_s19, %s2526_s20, %s2926_s28, %s2926_s28, %s2413_s29  }
  0x36   : > { %377 = sbr.rel (%p2560_p8) target bundleno = 3025 (0xbd1), region = 56 }
  0x3b   : > { %2381 = dma.done.wait (%p174_p1), [#allocation4], 1024  }
  0x3c   : > { %2383 = vsyncadd (%p174_p1), [#allocation4], 4294966272  ;;  %s384_s5 = sand.u32 1, %s2546_s15   ;;  %s386_s24 = sand.u32 1, %s2402_s14  }
  0x3d   : > { %s1794_s11 = sshll.u32 %s386_s24, 8  ;;  %s385_s23 = scalar_lea.sflag [#allocation7], %s384_s5 }
  0x3e   : > { %s2602_s27 = scalar_lea.vmem [#allocation6], %s1794_s11 }
  0x3f   : > { %2385 = dma.done.wait (%p2555_p4), %s385_s23, 4608  }
  0x40   : > { %2387 = vsyncadd (%p2555_p4), %s385_s23, 4294962688  ;;  %s1796_s20 = sshll.u32 %s2546_s15, 1  ;;  %s1795_s19 = sshll.u32 %s386_s24, 5  ;;  %v450_v0 = vlaneseq  ;;  %v2415_v2 = vmov 0.0  }
  0x41   : > { %p444_p5 = scmp.lt.s32.totalorder %s1796_s20, 3  ;;  %s2619_s12 = scalar_lea.vmem [#allocation8], %s1795_s19 }
  0x42   : > { %v451_v1 = vand.u32 127, %v450_v0  ;;  %460 = sbr.rel (%p1782_p6) target bundleno = 92 (0x5c), region = 72 }
  0x43   : > { %s2935_s20 = smov (!%p444_p5, %s1796_s20), 3 }
  0x44   : > { %vm452_vm0 = vcmp.lt.s32.totalorder %v451_v1, 96  ;;  %s1797_s21 = sshll.u32 %s2935_s20, 3 }
  0x45   : > { %v2610_v3 = vsel %vm452_vm0, 1.0, %v2415_v2  ;;  %s447_s28 = scalar_lea.vmem %s2913_s8, %s1797_s21 }
  0x46   : > { %v2615_v4 = vld [vmem:[%s447_s28] sm:$0xff]  ;;  %v2617_v5 = vld [vmem:[%s447_s28 + $0x8] sm:$0xff] }
  0x47   : > { %v461_v6 = vld [vmem:[%s2905_s0] sm:$0xff]  ;;  %v462_v7 = vld [vmem:[%s2905_s0 + $0x8] sm:$0xff]  ;;  %v2416_v8 = vmov 0.0   ;;  %v2417_v11 = vmov 8.0   ;;  %vm489_vm2 = vcmask 1041409  }
  0x48   : > { %465 = vst [vmem:[#allocation10] sm:$0xff] %v2416_v8  ;;  %v466_v9 = vrot.slane %v461_v6, 4  ;;  %v472_v10 = vrot.slane %v462_v7, 4  ;;  %2177 = vrcp.f32 %v2417_v11 }
  0x49   : > { %463 = vst [vmem:[#allocation9] sm:$0xff] %v461_v6 }
  0x4a   : > { %v467_v12 = vadd.f32 %v466_v9, %v461_v6  ;;  %464 = vst [vmem:[#allocation9 + $0x8] sm:$0xff] %v462_v7  ;;  %v473_v13 = vadd.f32 %v472_v10, %v462_v7 }
  0x4c   : > { %v468_v14 = vrot.slane %v467_v12, 2  ;;  %v474_v15 = vrot.slane %v473_v13, 2 }
  0x4e   : > { %v2178_v16 = vpop.eup %2177  ;;  %v469_v17 = vadd.f32 %v468_v14, %v467_v12  ;;  %v475_v18 = vadd.f32 %v474_v15, %v473_v13 }
  0x4f   : > { %v479_v19 = vmul.f32 8.0, %v2178_v16  ;;  %vm483_vm1 = vweird.f32 %v2178_v16 }
  0x50   : > { %v470_v20 = vrot.slane %v469_v17, 1  ;;  %v476_v21 = vrot.slane %v475_v18, 1 }
  0x51   : > { %v480_v22 = vsub.f32 1.0, %v479_v19 }
  0x52   : > { %v471_v24 = vadd.f32 %v470_v20, %v469_v17  ;;  %v477_v25 = vadd.f32 %v476_v21, %v475_v18 }
  0x53   : > { %v481_v23 = vmul.f32 %v2178_v16, %v480_v22 }
  0x55   : > { %v482_v26 = vadd.f32 %v2178_v16, %v481_v23 }
  0x57   : > { %v484_v27 = vsel %vm483_vm1, %v2178_v16, %v482_v26 }
  0x58   : > { %v485_v28 = vmul.f32 %v484_v27, %v471_v24  ;;  %v486_v29 = vmul.f32 %v484_v27, %v477_v25 }
  0x5a   : > { %v490_v30 = vsel %vm489_vm2, %v486_v29, %v485_v28 }
  0x5b   : > { %492 = vst [vmem:[#allocation10] sm:$0x3] %v490_v30 }
  0x5c PF: > { %v2068_v31 = vld [vmem:[%s2602_s27 + $0x38] sm:$0xff]  ;;  %v2067_v32 = vld [vmem:[%s2602_s27 + $0x30] sm:$0xff]  ;;  %v2066_v35 = vld [vmem:[%s2602_s27 + $0x28] sm:$0xff]  ;;  %v535_v51 = vperm.slane %v2615_v4, 0  ;;  %v618_v58 = vperm.slane %v2615_v4, 1  ;;  %s2419_s5 = smov 96  }
  0x5d   : > { %584 = vmatpush.bf16.msra.mxu0 %v2068_v31  ;;  %v2076_v33 = vld [vmem:[%s2602_s27 + $0x78] sm:$0xff]  ;;  %v2075_v34 = vld [vmem:[%s2602_s27 + $0x70] sm:$0xff]  ;;  %v2074_v36 = vld [vmem:[%s2602_s27 + $0x68] sm:$0xff]  ;;  %vm833_vm9 = vcmask 1041408   ;;  %vm826_vm10 = vcmask 15360   ;;  %s2420_s16 = smov 32  }
  0x5e   : > { %667 = vmatpush.bf16.msra.mxu1 %v2076_v33  ;;  %v2065_v37 = vld [vmem:[%s2602_s27 + $0x20] sm:$0xff]  ;;  %v2064_v39 = vld [vmem:[%s2602_s27 + $0x18] sm:$0xff]  ;;  %v2063_v40 = vld [vmem:[%s2602_s27 + $0x10] sm:$0xff]  ;;  %s2421_s13 = smov 64   ;;  %vm905_vm13 = vcmask 261120   ;;  %vm918_vm14 = vcmask 523520  }
  0x5f   : > { %v2073_v38 = vld [vmem:[%s2602_s27 + $0x60] sm:$0xff]  ;;  %v2062_v41 = vld [vmem:[%s2602_s27 + $0x8] sm:$0xff]  ;;  %v2072_v46 = vld [vmem:[%s2602_s27 + $0x58] sm:$0xff]  ;;  %vm931_vm15 = vcmask 785920   ;;  %vm944_vm0 = vcmask 1048320   ;;  %p2127_p7 = scmp.eq.s32.totalorder %s2546_s15, 1 }
  0x60   : > { %v2061_v42 = vld [vmem:[%s2602_s27] sm:$0xff]  ;;  %v494_v44 = vld [vmem:[#allocation9 + $0x8] sm:$0xff]  ;;  %v2071_v47 = vld [vmem:[%s2602_s27 + $0x50] sm:$0xff]  ;;  %s1658_s23 = sshll.u32 %s2914_s9, 4  ;;  %s2423_s20 = smov 128   ;;  %s1659_s23 = int_to_ptr.hbm [resolvable:$true] %s1658_s23 }
  0x61   : > { %585 = vmatpush.bf16.msra.mxu0 %v2067_v32  ;;  %v493_v43 = vld [vmem:[#allocation9] sm:$0xff]  ;;  %v2070_v48 = vld [vmem:[%s2602_s27 + $0x48] sm:$0xff]  ;;  %v2084_v17 = vld [vmem:[%s2602_s27 + $0xb8] sm:$0xff]  ;;  %s2424_s19 = smov 8   ;;  %s2425_s21 = smov [#allocation10]  }
  0x62   : > { %668 = vmatpush.bf16.msra.mxu1 %v2075_v34  ;;  %v534_v45 = vpack.c.bf16 %v494_v44, %v493_v43  ;;  %v2069_v49 = vld [vmem:[%s2602_s27 + $0x40] sm:$0xff]  ;;  %803 = vmatpush.bf16.msra.mxu2 %v2084_v17  ;;  %v2083_v18 = vld [vmem:[%s2602_s27 + $0xb0] sm:$0xff]  ;;  %v2082_v19 = vld [vmem:[%s2602_s27 + $0xa8] sm:$0xff]  ;;  %s1671_s29 = sshll.u32 %s2425_s21, 4  ;;  %s1673_s30 = sshll.u32 %s2915_s10, 4  ;;  %s1672_s29 = int_to_ptr.vmem [resolvable:$true] %s1671_s29  ;;  %s1674_s30 = int_to_ptr.hbm [resolvable:$true] %s1673_s30 }
  0x63   : > { %v2081_v20 = vld [vmem:[%s2602_s27 + $0xa0] sm:$0xff]  ;;  %v2080_v21 = vld [vmem:[%s2602_s27 + $0x98] sm:$0xff]  ;;  %v2079_v22 = vld [vmem:[%s2602_s27 + $0x90] sm:$0xff] }
  0x64   : > { %v2078_v23 = vld [vmem:[%s2602_s27 + $0x88] sm:$0xff]  ;;  %v2077_v26 = vld [vmem:[%s2602_s27 + $0x80] sm:$0xff] }
  0x65   : > { %586 = vmatpush.bf16.msra.mxu0 %v2066_v35 }
  0x66   : > { %669 = vmatpush.bf16.msra.mxu1 %v2074_v36  ;;  %804 = vmatpush.bf16.msra.mxu2 %v2083_v18 }
  0x69   : > { %587 = vmatpush.bf16.msra.mxu0 %v2065_v37 }
  0x6a   : > { %670 = vmatpush.bf16.msra.mxu1 %v2073_v38  ;;  %805 = vmatpush.bf16.msra.mxu2 %v2082_v19 }
  0x6d   : > { %588 = vmatpush.bf16.msra.mxu0 %v2064_v39 }
  0x6e   : > { %671 = vmatpush.bf16.msra.mxu1 %v2072_v46  ;;  %806 = vmatpush.bf16.msra.mxu2 %v2081_v20 }
  0x71   : > { %589 = vmatpush.bf16.msra.mxu0 %v2063_v40 }
  0x72   : > { %672 = vmatpush.bf16.msra.mxu1 %v2071_v47  ;;  %807 = vmatpush.bf16.msra.mxu2 %v2080_v21  ;;  %v730_v47 = vperm.slane %v2615_v4, 3 }
  0x75   : > { %590 = vmatpush.bf16.msra.mxu0 %v2062_v41 }
  0x76   : > { %673 = vmatpush.bf16.msra.mxu1 %v2070_v48  ;;  %808 = vmatpush.bf16.msra.mxu2 %v2079_v22 }
  0x79   : > { %591 = vmatpush.bf16.msra.mxu0 %v2061_v42 }
  0x7a   : > { %674 = vmatpush.bf16.msra.mxu1 %v2069_v49  ;;  %809 = vmatpush.bf16.msra.mxu2 %v2078_v23 }
  0x7c   : > { %592 = vmatmul.bf16.vlgmr.msra.gmra.mxu0 %v534_v45 }
  0x7e   : > { %810 = vmatpush.bf16.msra.mxu2 %v2077_v26 }
  0xf9   : > { %v593_v50 = vpop.f32.mrf.mxu0 }
  0xfa   : > { %v594_v52 = vadd.f32 %v593_v50, %v535_v51 }
  0xfc   : > { %v598_v55 = vmax.f32 %v594_v52, 0.0 }
 0x101   : > { %v595_v53 = vpop.f32.mrf.mxu0 }
 0x102   : > { %v596_v54 = vadd.f32 %v595_v53, %v535_v51 }
 0x104   : > { %v599_v56 = vmax.f32 %v596_v54, 0.0 }
 0x106   : > { %v617_v57 = vpack.c.bf16 %v599_v56, %v598_v55  ;;  %v495_v56 = vld [vmem:[#allocation10] sm:$0xff] }
 0x108   : > { %675 = vmatmul.bf16.vlgmr.msra.gmra.mxu1 %v617_v57  ;;  %v2663_v57 = vpack.c.bf16 %v495_v56, %v495_v56 }
 0x185   : > { %v676_v59 = vpop.f32.mrf.mxu1 }
 0x186   : > { %v677_v60 = vadd.f32 %v676_v59, %v618_v58  ;;  %v2418_v59 = vmov 0  }
 0x187   : > { %2179 = vset.pattern.permute.xlu1 %v2418_v59  ;;  %2180 = vset.pattern.permute.xlu2 %v2418_v59 }
 0x188   : > { %v681_v61 = vadd.f32 %v677_v60, %v493_v43  ;;  %v727_v43 = vperm.slane %v2615_v4, 2  ;;  %2181 = vset.pattern.permute.xlu0 %v2418_v59 }
 0x18a   : > { %v683_v62 = vmul.f32 %v2610_v3, %v681_v61  ;;  %v754_v61 = vperm.slane %v2615_v4, 4 }
 0x18c   : > { %685 = vadd.xlane.f32.xlu0 %v683_v62 }
 0x18d   : > { %v678_v63 = vpop.f32.mrf.mxu1 }
 0x18e   : > { %v679_v1 = vadd.f32 %v678_v63, %v618_v58  ;;  %v500_v58 = vld [vmem:[%s2908_s3] sm:$0xff] }
 0x190   : > { %v682_v2 = vadd.f32 %v679_v1, %v494_v44 }
 0x192   : > { %v684_v6 = vmul.f32 %v2610_v3, %v682_v2 }
 0x194   : > { %687 = vadd.xlane.f32.xlu0 %v684_v6 }
 0x1ff   : > { %v686_v7 = vpop.xlane.xlu0 %685 }
 0x200   : > { %v689_v8 = vmul.f32 0.010416667, %v686_v7 }
 0x202   : > { %v691_v9 = vsub.f32 %v683_v62, %v689_v8  ;;  %v501_v8 = vld [vmem:[%s2908_s3 + $0x8] sm:$0xff] }
 0x204   : > { %v693_v10 = vmul.f32 %v2610_v3, %v691_v9  ;;  %v498_v9 = vld [vmem:[%s2907_s2] sm:$0xff] }
 0x206   : > { %v695_v11 = vmul.f32 %v693_v10, %v693_v10 }
 0x207   : > { %v688_v12 = vpop.xlane.xlu0 %687 }
 0x208   : > { %v690_v13 = vmul.f32 0.010416667, %v688_v12  ;;  %697 = vadd.xlane.f32.xlu1 %v695_v11  ;;  %v2688_v11 = vld [vmem:[%s2909_s4] sm:$0xff] }
 0x20a   : > { %v692_v14 = vsub.f32 %v684_v6, %v690_v13  ;;  %v2696_v13 = vld [vmem:[%s2909_s4 + $0x8] sm:$0xff] }
 0x20c   : > { %v694_v15 = vmul.f32 %v2610_v3, %v692_v14 }
 0x20e   : > { %v696_v16 = vmul.f32 %v694_v15, %v694_v15 }
 0x210   : > { %699 = vadd.xlane.f32.xlu1 %v696_v16  ;;  %v870_v16 = vshrl.u32 %v450_v0, 7 }
 0x212   : > { %vm888_vm11 = vcmp.lt.s32.totalorder %v870_v16, 7  ;;  %vm871_vm12 = vcmp.lt.s32.totalorder %v870_v16, 1 }
 0x229   : > { %893 = vperm.xlu1 %2179, %v500_v58  }
 0x27b   : > { %v698_v24 = vpop.xlane.xlu1 %697 }
 0x27c   : > { %v701_v25 = vmul.f32 0.010416667, %v698_v24 }
 0x27e   : > { %v703_v27 = vadd.f32 1e-05, %v701_v25 }
 0x280   : > { %2182 = vrsqrt.f32 %v703_v27  ;;  %vm711_vm4 = vweird.f32 %v703_v27 }
 0x283   : > { %v700_v28 = vpop.xlane.xlu1 %699 }
 0x284   : > { %v702_v29 = vmul.f32 0.010416667, %v700_v28 }
 0x286   : > { %v2183_v30 = vpop.eup %2182  ;;  %v704_v31 = vadd.f32 1e-05, %v702_v29 }
 0x287   : > { %v706_v32 = vmul.f32 %v2183_v30, %v703_v27  ;;  %vm712_vm3 = vweird.f32 %v2183_v30 }
 0x288   : > { %2184 = vrsqrt.f32 %v704_v31  ;;  %vm713_vm5 = vmor %vm711_vm4, %vm712_vm3  ;;  %vm721_vm7 = vweird.f32 %v704_v31 }
 0x289   : > { %v707_v33 = vmul.f32 %v2183_v30, %v706_v32 }
 0x28b   : > { %v708_v34 = vmul.f32 0.5, %v707_v33 }
 0x28d   : > { %v709_v35 = vsub.f32 1.5, %v708_v34 }
 0x28e   : > { %v2185_v36 = vpop.eup %2184 }
 0x28f   : > { %v710_v37 = vmul.f32 %v2183_v30, %v709_v35  ;;  %v716_v38 = vmul.f32 %v2185_v36, %v704_v31  ;;  %vm722_vm6 = vweird.f32 %v2185_v36 }
 0x290   : > { %vm723_vm8 = vmor %vm721_vm7, %vm722_vm6 }
 0x291   : > { %v714_v39 = vsel %vm713_vm5, %v2183_v30, %v710_v37  ;;  %v717_v40 = vmul.f32 %v2185_v36, %v716_v38 }
 0x292   : > { %v725_v42 = vmul.f32 %v714_v39, %v693_v10  ;;  %v499_v10 = vld [vmem:[%s2907_s2 + $0x8] sm:$0xff] }
 0x293   : > { %v718_v41 = vmul.f32 0.5, %v717_v40 }
 0x294   : > { %v728_v46 = vmul.f32 %v727_v43, %v725_v42 }
 0x295   : > { %v719_v44 = vsub.f32 1.5, %v718_v41 }
 0x296   : > { %v731_v51 = vadd.f32 %v730_v47, %v728_v46  ;;  %v2060_v46 = vld [vmem:[#allocation3 + $0x38] sm:$0xff] }
 0x297   : > { %v720_v45 = vmul.f32 %v2185_v36, %v719_v44 }
 0x298   : > { %v733_v53 = vmul.f32 %v2610_v3, %v731_v51  ;;  %v2055_v51 = vld [vmem:[#allocation3 + $0x10] sm:$0xff] }
 0x299   : > { %v724_v48 = vsel %vm723_vm8, %v2185_v36, %v720_v45 }
 0x29a   : > { %v726_v49 = vmul.f32 %v724_v48, %v694_v15  ;;  %v2058_v48 = vld [vmem:[#allocation3 + $0x28] sm:$0xff] }
 0x29b   : > { %v894_v22 = vpop.permute.xlu1 %893 }
 0x29c   : > { %v729_v50 = vmul.f32 %v727_v43, %v726_v49  ;;  %v2057_v49 = vld [vmem:[#allocation3 + $0x20] sm:$0xff] }
 0x29e   : > { %v732_v52 = vadd.f32 %v730_v47, %v729_v50  ;;  %v2059_v47 = vld [vmem:[#allocation3 + $0x30] sm:$0xff]  ;;  %v2056_v50 = vld [vmem:[#allocation3 + $0x18] sm:$0xff] }
 0x2a0   : > { %v734_v54 = vmul.f32 %v2610_v3, %v732_v52 }
 0x2a2   : > { %v752_v55 = vpack.c.bf16 %v734_v54, %v733_v53  ;;  %v2735_v53 = vld [vmem:[#allocation3 + $0x8] sm:$0xff]  ;;  %v2738_v54 = vld [vmem:[#allocation3] sm:$0xff] }
 0x2a4   : > { %811 = vmatmul.bf16.vlgmr.msra.gmra.mxu2 %v752_v55 }
 0x2b4   : > { %816 = vmatmul.bf16.gmra.mxu2 %v2663_v57 }
 0x327   : > { %v812_v60 = vpop.f32.mrf.mxu2 }
 0x328   : > { %v813_v7 = vadd.f32 %v812_v60, %v754_v61 }
 0x32f   : > { %v814_v62 = vpop.f32.mrf.mxu2 }
 0x330   : > { %v2670_v63 = vadd.f32 %v814_v62, %v754_v61 }
 0x332   : > { %863 = vrot.lane.b32.xlu0 %v2670_v63, %s2419_s5 }
 0x337   : > { %v817_v1 = vpop.f32.mrf.mxu2 }
 0x338   : > { %v818_v2 = vadd.f32 %v817_v1, %v754_v61 }
 0x33a   : > { %824 = vrot.lane.b32.xlu2 %v818_v2, %s2419_s5 }
 0x33f   : > { %v819_v6 = vpop.f32.mrf.mxu2 }
 0x342   : > { %861 = vrot.lane.b32.xlu2 %v813_v7, %s2419_s5 }
 0x34a   : > { %898 = vperm.xlu2 %2180, %v501_v8  }
 0x352   : > { %876 = vperm.xlu2 %2180, %v498_v9  }
 0x35a   : > { %881 = vperm.xlu2 %2180, %v499_v10  }
 0x394   : > { %v825_v12 = vpop.permute.xlu2 %824 }
 0x395   : > { %1928 = vmatpush.msk.msra.mxu3 %vm833_vm9, %v825_v12 }
 0x396   : > { %1929 = vmatmul.msk.f32.vlgmr.msra.gmra.mxu3 %vm826_vm10, %v2688_v11 }
 0x397   : > { %998 = vmatpush.bf16.msrb.mxu3 %v2060_v46 }
 0x39b   : > { %999 = vmatpush.bf16.msrb.mxu3 %v2059_v47 }
 0x39c   : > { %v2698_v14 = vpop.permute.xlu2 %861 }
 0x39d   : > { %v908_v15 = vmul.f32 %v2698_v14, %v813_v7  ;;  %v886_v19 = vrot.slane %v2698_v14, 1  ;;  %v867_v27 = vrot.slane %v2698_v14, 7 }
 0x39e   : > { %1930 = vmatmul.msk.f32.gmra.mxu3 %vm826_vm10, %v2696_v13 }
 0x39f   : > { %912 = vrot.lane.b32.xlu0 %v908_v15, %s2420_s16  ;;  %1000 = vmatpush.bf16.msrb.mxu3 %v2058_v48 }
 0x3a3   : > { %1001 = vmatpush.bf16.msrb.mxu3 %v2057_v49 }
 0x3a4   : > { %v2705_v17 = vpop.permute.xlu0 %863  ;;  %v899_v18 = vpop.permute.xlu2 %898 }
 0x3a5   : > { %v887_v20 = vrot.slane %v2705_v17, 1  ;;  %v909_v21 = vmul.f32 %v2705_v17, %v2670_v63  ;;  %v868_v25 = vrot.slane %v2705_v17, 7 }
 0x3a7   : > { %v890_v23 = vsel %vm888_vm11, %v887_v20, %v886_v19  ;;  %914 = vrot.lane.b32.xlu2 %v909_v21, %s2420_s16  ;;  %v889_v24 = vsel %vm888_vm11, %v886_v19, %v887_v20  ;;  %v873_v30 = vsel %vm871_vm12, %v868_v25, %v867_v27  ;;  %v872_v34 = vsel %vm871_vm12, %v867_v27, %v868_v25 }
 0x3a8   : > { %v2713_v26 = vmul.f32 %v899_v18, %v890_v23  ;;  %v2715_v0 = vmul.f32 %v894_v22, %v889_v24  ;;  %1002 = vmatpush.bf16.msrb.mxu3 %v2056_v50 }
 0x3aa   : > { %v922_v28 = vmul.f32 %v2713_v26, %v2670_v63  ;;  %v921_v29 = vmul.f32 %v2715_v0, %v813_v7 }
 0x3ac   : > { %927 = vrot.lane.b32.xlu0 %v922_v28, %s2421_s13  ;;  %v877_v31 = vpop.permute.xlu2 %876  ;;  %925 = vrot.lane.b32.xlu1 %v921_v29, %s2421_s13 }
 0x3ad   : > { %v2723_v32 = vmul.f32 %v877_v31, %v873_v30  ;;  %1003 = vmatpush.bf16.msrb.mxu3 %v2055_v51 }
 0x3af   : > { %v903_v33 = vmul.f32 %v2723_v32, %v813_v7 }
 0x3b1   : > { %906 = vst.msk [vmem:[#allocation2] sm:$0xff] %vm905_vm13, %v903_v33  ;;  %1004 = vmatpush.bf16.msrb.mxu3 %v2735_v53 }
 0x3b4   : > { %v882_v35 = vpop.permute.xlu2 %881 }
 0x3b5   : > { %v2727_v36 = vmul.f32 %v882_v35, %v872_v34  ;;  %1005 = vmatpush.bf16.msrb.mxu3 %v2738_v54 }
 0x3b7   : > { %v904_v37 = vmul.f32 %v2727_v36, %v2670_v63 }
 0x3b9   : > { %907 = vst.msk [vmem:[#allocation2 + $0x8] sm:$0xff] %vm905_vm13, %v904_v37 }
 0x401   : > { %v915_v38 = vpop.permute.xlu2 %914 }
 0x402   : > { %920 = vst.msk [vmem:[#allocation2 + $0x8] sm:$0xff] %vm918_vm14, %v915_v38 }
 0x411   : > { %v913_v39 = vpop.permute.xlu0 %912 }
 0x412   : > { %919 = vst.msk [vmem:[#allocation2] sm:$0xff] %vm918_vm14, %v913_v39 }
 0x419   : > { %v853_v40 = vpop.f32.mrf.mxu3 }
 0x41a   : > { %v934_v41 = vmul.f32 %v853_v40, %v813_v7 }
 0x41c   : > { %938 = vrot.lane.b32.xlu2 %v934_v41, %s2419_s5 }
 0x41e   : > { %v928_v42 = vpop.permute.xlu0 %927  ;;  %v926_v43 = vpop.permute.xlu1 %925 }
 0x41f   : > { %933 = vst.msk [vmem:[#allocation2 + $0x8] sm:$0xff] %vm931_vm15, %v928_v42 }
 0x420   : > { %932 = vst.msk [vmem:[#allocation2] sm:$0xff] %vm931_vm15, %v926_v43 }
 0x421   : > { %v856_v44 = vpop.f32.mrf.mxu3 }
 0x422   : > { %v935_v45 = vmul.f32 %v856_v44, %v2670_v63 }
 0x424   : > { %940 = vrot.lane.b32.xlu1 %v935_v45, %s2419_s5 }
 0x476   : > { %v939_v52 = vpop.permute.xlu2 %938 }
 0x477   : > { %945 = vst.msk [vmem:[#allocation2] sm:$0xff] %vm944_vm0, %v939_v52 }
 0x47e   : > { %v947_v56 = vld [vmem:[#allocation2] sm:$0xff] }
 0x496   : > { %v941_v55 = vpop.permute.xlu1 %940 }
 0x497   : > { %946 = vst.msk [vmem:[#allocation2 + $0x8] sm:$0xff] %vm944_vm0, %v941_v55  ;;  %v2086_v55 = vld [vmem:[%s2619_s12 + $0x8] sm:$0xff] }
 0x498   : > { %1229 = vmatpush.bf16.msrb.mxu0 %v2086_v55 }
 0x49e   : > { %v948_v58 = vld [vmem:[#allocation2 + $0x8] sm:$0xff] }
 0x49f   : > { %v949_v59 = vpack.c.bf16 %v948_v58, %v947_v56 }
 0x4a1   : > { %1006 = vmatmul.bf16.vlgmr.msrb.gmra.mxu3 %v949_v59 }
 0x524   : > { %v1007_v60 = vpop.f32.mrf.mxu3 }
 0x525   : > { %v2741_v61 = vmul.f32 0.35355338, %v1007_v60 }
 0x527   : > { %1016 = vrot.lane.b32.xlu0 %v2741_v61, %s2419_s5 }
 0x52c   : > { %v1009_v62 = vpop.f32.mrf.mxu3 }
 0x52d   : > { %v2745_v63 = vmul.f32 0.35355338, %v1009_v62 }
 0x52f   : > { %1018 = vrot.lane.b32.xlu2 %v2745_v63, %s2419_s5 }
 0x589   : > { %v1019_v1 = vpop.permute.xlu2 %1018 }
 0x58a   : > { %v1023_v2 = vmax.f32 %v2745_v63, %v1019_v1 }
 0x58c   : > { %1028 = vrot.lane.b32.xlu0 %v1023_v2, %s2421_s13 }
 0x599   : > { %v1017_v6 = vpop.permute.xlu0 %1016 }
 0x59a   : > { %v1022_v7 = vmax.f32 %v2741_v61, %v1017_v6 }
 0x59c   : > { %1026 = vrot.lane.b32.xlu1 %v1022_v7, %s2421_s13 }
 0x5fe   : > { %v1029_v8 = vpop.permute.xlu0 %1028 }
 0x5ff   : > { %v2753_v9 = vmax.f32 %v1023_v2, %v1029_v8  ;;  %v2085_v2 = vld [vmem:[%s2619_s12] sm:$0xff] }
 0x600   : > { %1230 = vmatpush.bf16.msrb.mxu0 %v2085_v2 }
 0x601   : > { %1044 = vrot.lane.b32.xlu1 %v2753_v9, %s2420_s16  ;;  %v1035_v50 = vsub.f32 %v2745_v63, %v2753_v9 }
 0x603   : > { %v1038_v56 = vmul.f32 1.442695, %v1035_v50 }
 0x604   : > { %1442 = vmatpush.bf16.msra.mxu0 %v2735_v53 }
 0x608   : > { %1443 = vmatpush.bf16.msra.mxu0 %v2738_v54 }
 0x60e   : > { %v1027_v10 = vpop.permute.xlu1 %1026 }
 0x60f   : > { %v2757_v12 = vmax.f32 %v1022_v7, %v1027_v10 }
 0x611   : > { %1042 = vrot.lane.b32.xlu2 %v2757_v12, %s2420_s16  ;;  %1054 = vrot.lane.b32.xlu0 %v2757_v12, %s2421_s13 }
 0x612   : > { %1066 = vrot.lane.b32.xlu1 %v2757_v12, %s2419_s5 }
 0x619   : > { %1068 = vrot.lane.b32.xlu0 %v2753_v9, %s2419_s5  ;;  %1056 = vrot.lane.b32.xlu2 %v2753_v9, %s2421_s13 }
 0x61a   : > { %1164 = vrot.lane.b32.xlu1 %v2713_v26, %s2420_s16 }
 0x621   : > { %1182 = vrot.lane.b32.xlu0 %v853_v40, %s2421_s13  ;;  %1162 = vrot.lane.b32.xlu2 %v2715_v0, %s2420_s16 }
 0x629   : > { %1184 = vrot.lane.b32.xlu2 %v856_v44, %s2421_s13 }
 0x66b   : > { %v1043_v15 = vpop.permute.xlu2 %1042 }
 0x66c   : > { %v1048_v16 = vsub.f32 %v2741_v61, %v1043_v15 }
 0x66e   : > { %v1050_v18 = vmul.f32 1.442695, %v1048_v16 }
 0x670   : > { %2186 = vpow2.f32 %v1050_v18 }
 0x673   : > { %v1057_v19 = vpop.permute.xlu2 %1056  ;;  %v1045_v23 = vpop.permute.xlu1 %1044 }
 0x674   : > { %v1061_v20 = vsub.f32 %v2745_v63, %v1057_v19  ;;  %v1049_v24 = vsub.f32 %v2745_v63, %v1045_v23 }
 0x676   : > { %v2187_v21 = vpop.eup %2186  ;;  %v1064_v22 = vmul.f32 1.442695, %v1061_v20  ;;  %v1052_v26 = vmul.f32 1.442695, %v1049_v24 }
 0x677   : > { %1080 = vrot.lane.b32.xlu1 %v2187_v21, %s2419_s5  ;;  %v1148_v43 = vmul.f32 %v2187_v21, %v2698_v14  ;;  %v1034_v14 = vsub.f32 %v2741_v61, %v2757_v12 }
 0x678   : > { %2188 = vpow2.f32 %v1064_v22 }
 0x679   : > { %2190 = vpow2.f32 %v1052_v26  ;;  %v1036_v49 = vmul.f32 1.442695, %v1034_v14 }
 0x67b   : > { %v1163_v44 = vpop.permute.xlu2 %1162 }
 0x67e   : > { %v2189_v25 = vpop.eup %2188 }
 0x67f   : > { %1092 = vrot.lane.b32.xlu1 %v2189_v25, %s2421_s13  ;;  %v2191_v33 = vpop.eup %2190 }
 0x680   : > { %v1149_v39 = vmul.f32 %v2191_v33, %v2705_v17 }
 0x683   : > { %v1055_v0 = vpop.permute.xlu0 %1054  ;;  %v1185_v47 = vpop.permute.xlu2 %1184 }
 0x684   : > { %v1067_v27 = vpop.permute.xlu1 %1066  ;;  %v1060_v28 = vsub.f32 %v2741_v61, %v1055_v0 }
 0x685   : > { %v1072_v29 = vsub.f32 %v2741_v61, %v1067_v27 }
 0x686   : > { %v1062_v30 = vmul.f32 1.442695, %v1060_v28 }
 0x687   : > { %v1074_v31 = vmul.f32 1.442695, %v1072_v29  ;;  %1140 = vrot.lane.b32.xlu1 %v2723_v32, %s2419_s5 }
 0x688   : > { %2192 = vpow2.f32 %v1062_v30 }
 0x689   : > { %2194 = vpow2.f32 %v1074_v31 }
 0x68b   : > { %v1069_v34 = vpop.permute.xlu0 %1068 }
 0x68c   : > { %v1073_v35 = vsub.f32 %v2745_v63, %v1069_v34  ;;  %v1165_v17 = vpop.permute.xlu1 %1164 }
 0x68d   : > { %v1169_v45 = vmul.f32 %v2189_v25, %v1165_v17 }
 0x68e   : > { %v2193_v37 = vpop.eup %2192  ;;  %v1076_v38 = vmul.f32 1.442695, %v1073_v35 }
 0x68f   : > { %v2195_v40 = vpop.eup %2194  ;;  %1090 = vrot.lane.b32.xlu2 %v2193_v37, %s2421_s13  ;;  %1154 = vrot.lane.b32.xlu1 %v1149_v39, %s2419_s5  ;;  %v1168_v46 = vmul.f32 %v2193_v37, %v1163_v44 }
 0x690   : > { %2196 = vpow2.f32 %v1076_v38  ;;  %1100 = vrot.lane.b32.xlu0 %v2195_v40, %s2420_s16 }
 0x691   : > { %2198 = vpow2.f32 %v1036_v49 }
 0x692   : > { %2200 = vpow2.f32 %v1038_v56 }
 0x693   : > { %v1183_v41 = vpop.permute.xlu0 %1182 }
 0x694   : > { %v1188_v42 = vmul.f32 %v2195_v40, %v1183_v41 }
 0x696   : > { %v2197_v32 = vpop.eup %2196 }
 0x697   : > { %1102 = vrot.lane.b32.xlu2 %v2197_v32, %s2420_s16  ;;  %1192 = vrot.lane.b32.xlu1 %v1188_v42, %s2420_s16  ;;  %v1189_v48 = vmul.f32 %v2197_v32, %v1185_v47  ;;  %v2199_v51 = vpop.eup %2198 }
 0x698   : > { %1082 = vrot.lane.b32.xlu0 %v2191_v33, %s2419_s5  ;;  %v2201_v61 = vpop.eup %2200 }
 0x69f   : > { %1152 = vrot.lane.b32.xlu2 %v1148_v43, %s2419_s5 }
 0x6a0   : > { %1142 = vrot.lane.b32.xlu0 %v2727_v36, %s2419_s5 }
 0x6a7   : > { %1174 = vrot.lane.b32.xlu2 %v1169_v45, %s2421_s13 }
 0x6a8   : > { %1172 = vrot.lane.b32.xlu0 %v1168_v46, %s2421_s13 }
 0x6b0   : > { %1194 = vrot.lane.b32.xlu0 %v1189_v48, %s2420_s16 }
 0x6e9   : > { %v1081_v36 = vpop.permute.xlu1 %1080  ;;  %v1091_v58 = vpop.permute.xlu2 %1090 }
 0x6ea   : > { %v1086_v52 = vadd.f32 %v2199_v51, %v1081_v36  ;;  %v1207_v36 = vperm.slane %v2615_v4, 5 }
 0x6ec   : > { %v1096_v59 = vadd.f32 %v1091_v58, %v1086_v52 }
 0x6f1   : > { %v1093_v60 = vpop.permute.xlu1 %1092  ;;  %v1103_v63 = vpop.permute.xlu2 %1102 }
 0x6f9   : > { %v1141_v8 = vpop.permute.xlu1 %1140  ;;  %v1153_v19 = vpop.permute.xlu2 %1152 }
 0x6fa   : > { %v1146_v22 = vmul.f32 %v2199_v51, %v1141_v8 }
 0x6fc   : > { %v1158_v0 = vadd.f32 %v1153_v19, %v1146_v22 }
 0x701   : > { %v1155_v20 = vpop.permute.xlu1 %1154  ;;  %v1175_v38 = vpop.permute.xlu2 %1174 }
 0x702   : > { %v1101_v62 = vpop.permute.xlu0 %1100 }
 0x703   : > { %v1106_v1 = vadd.f32 %v1101_v62, %v1096_v59 }
 0x705   : > { %2202 = vrcp.f32 %v1106_v1  ;;  %vm1113_vm3 = vweird.f32 %v1106_v1  ;;  %v1119_v30 = vand.u32 2147483648, %v1106_v1  ;;  %v1117_v35 = vand.u32 2147483647, %v1106_v1 }
 0x707   : > { %v1120_v43 = vor.u32 1.1754944e-38, %v1119_v30  ;;  %vm1118_vm7 = vcmp.eq.f32.partialorder %v1117_v35, 8.507059e+37 }
 0x709   : > { %v1193_v39 = vpop.permute.xlu1 %1192 }
 0x70a   : > { %v1083_v6 = vpop.permute.xlu0 %1082 }
 0x70b   : > { %v1087_v7 = vadd.f32 %v2201_v61, %v1083_v6  ;;  %v2203_v10 = vpop.eup %2202 }
 0x70c   : > { %v1109_v15 = vmul.f32 %v2203_v10, %v1106_v1  ;;  %vm1114_vm1 = vweird.f32 %v2203_v10 }
 0x70d   : > { %v1097_v9 = vadd.f32 %v1093_v60, %v1087_v7  ;;  %vm2807_vm4 = vmor %vm1113_vm3, %vm1114_vm1 }
 0x70e   : > { %v1110_v18 = vsub.f32 1.0, %v1109_v15  ;;  %v2091_v15 = vld [vmem:[%s2602_s27 + $0xe0] sm:$0xff] }
 0x70f   : > { %v1107_v12 = vadd.f32 %v1103_v63, %v1097_v9  ;;  %v2094_v9 = vld [vmem:[%s2602_s27 + $0xf8] sm:$0xff] }
 0x710   : > { %v1111_v24 = vmul.f32 %v2203_v10, %v1110_v18  ;;  %1362 = vmatpush.bf16.msrb.mxu1 %v2094_v9  ;;  %v2089_v18 = vld [vmem:[%s2602_s27 + $0xd0] sm:$0xff] }
 0x711   : > { %2204 = vrcp.f32 %v1107_v12  ;;  %v1134_v33 = vand.u32 2147483648, %v1107_v12  ;;  %vm1128_vm5 = vweird.f32 %v1107_v12  ;;  %v1132_v37 = vand.u32 2147483647, %v1107_v12 }
 0x712   : > { %v1143_v16 = vpop.permute.xlu0 %1142  ;;  %v1112_v28 = vadd.f32 %v2203_v10, %v1111_v24 }
 0x713   : > { %v1147_v23 = vmul.f32 %v2201_v61, %v1143_v16  ;;  %v1135_v44 = vor.u32 1.1754944e-38, %v1134_v33  ;;  %vm1133_vm8 = vcmp.eq.f32.partialorder %v1132_v37, 8.507059e+37  ;;  %v2090_v16 = vld [vmem:[%s2602_s27 + $0xd8] sm:$0xff]  ;;  %v1281_v33 = vperm.slane %v2615_v4, 6 }
 0x714   : > { %v1116_v40 = vsel %vm2807_vm4, %v2203_v10, %v1112_v28  ;;  %v2093_v10 = vld [vmem:[%s2602_s27 + $0xf0] sm:$0xff]  ;;  %vm1496_vm4 = vcmask 1041409  }
 0x715   : > { %v1159_v27 = vadd.f32 %v1155_v20, %v1147_v23  ;;  %v1121_v46 = vsel %vm1118_vm7, %v1120_v43, %v1116_v40  ;;  %1363 = vmatpush.bf16.msrb.mxu1 %v2093_v10  ;;  %v1284_v40 = vperm.slane %v2615_v4, 7 }
 0x717   : > { %v2205_v21 = vpop.eup %2204  ;;  %v1179_v32 = vadd.f32 %v1175_v38, %v1159_v27 }
 0x718   : > { %v1124_v53 = vmul.f32 %v2205_v21, %v1107_v12  ;;  %vm1129_vm2 = vweird.f32 %v2205_v21  ;;  %v2092_v12 = vld [vmem:[%s2602_s27 + $0xe8] sm:$0xff] }
 0x719   : > { %vm1130_vm6 = vmor %vm1128_vm5, %vm1129_vm2  ;;  %1364 = vmatpush.bf16.msrb.mxu1 %v2092_v12 }
 0x71a   : > { %v1173_v25 = vpop.permute.xlu0 %1172  ;;  %v1125_v26 = vsub.f32 1.0, %v1124_v53  ;;  %v2087_v53 = vld [vmem:[%s2602_s27 + $0xc0] sm:$0xff] }
 0x71b   : > { %v1178_v29 = vadd.f32 %v1173_v25, %v1158_v0 }
 0x71c   : > { %v1126_v54 = vmul.f32 %v2205_v21, %v1125_v26 }
 0x71d   : > { %v1198_v41 = vadd.f32 %v1193_v39, %v1178_v29  ;;  %1365 = vmatpush.bf16.msrb.mxu1 %v2091_v15 }
 0x71e   : > { %v1127_v31 = vadd.f32 %v2205_v21, %v1126_v54 }
 0x71f   : > { %v1200_v48 = vmul.f32 %v1198_v41, %v1121_v46 }
 0x720   : > { %v1131_v42 = vsel %vm1130_vm6, %v2205_v21, %v1127_v31  ;;  %v2088_v21 = vld [vmem:[%s2602_s27 + $0xc8] sm:$0xff] }
 0x721   : > { %v1136_v47 = vsel %vm1133_vm8, %v1135_v44, %v1131_v42  ;;  %1366 = vmatpush.bf16.msrb.mxu1 %v2090_v16 }
 0x722   : > { %v1195_v17 = vpop.permute.xlu0 %1194 }
 0x723   : > { %v1199_v45 = vadd.f32 %v1195_v17, %v1179_v32 }
 0x725   : > { %v1201_v14 = vmul.f32 %v1199_v45, %v1136_v47  ;;  %1367 = vmatpush.bf16.msrb.mxu1 %v2089_v18 }
 0x727   : > { %v1206_v49 = vpack.c.bf16 %v1201_v14, %v1200_v48 }
 0x729   : > { %1971 = vmatmul.msk.bf16.vlgmr.msrb.gmra.mxu0 %vm905_vm13, %v1206_v49  ;;  %1368 = vmatpush.bf16.msrb.mxu1 %v2088_v21 }
 0x72d   : > { %1369 = vmatpush.bf16.msrb.mxu1 %v2087_v53 }
 0x7a6   : > { %v1232_v50 = vpop.f32.mrf.mxu0 }
 0x7a7   : > { %v1233_v51 = vadd.f32 %v1232_v50, %v1207_v36  ;;  %v1313_v50 = vperm.slane %v2617_v5, 0 }
 0x7a9   : > { %v1237_v52 = vmul.f32 %v2610_v3, %v1233_v51 }
 0x7ab   : > { %1239 = vadd.xlane.f32.xlu2 %v1237_v52 }
 0x7ae   : > { %v1234_v55 = vpop.f32.mrf.mxu0 }
 0x7af   : > { %v1235_v56 = vadd.f32 %v1234_v55, %v1207_v36 }
 0x7b1   : > { %v1238_v58 = vmul.f32 %v2610_v3, %v1235_v56 }
 0x7b3   : > { %1241 = vadd.xlane.f32.xlu1 %v1238_v58 }
 0x81e   : > { %v1240_v59 = vpop.xlane.xlu2 %1239 }
 0x81f   : > { %v1243_v60 = vmul.f32 0.010416667, %v1240_v59 }
 0x821   : > { %v1245_v62 = vsub.f32 %v1237_v52, %v1243_v60  ;;  %v496_v52 = vld [vmem:[%s2906_s1] sm:$0xff]  ;;  %v497_v60 = vld [vmem:[%s2906_s1 + $0x8] sm:$0xff] }
 0x823   : > { %v1247_v1 = vmul.f32 %v2610_v3, %v1245_v62 }
 0x825   : > { %v1249_v2 = vmul.f32 %v1247_v1, %v1247_v1 }
 0x826   : > { %v1242_v61 = vpop.xlane.xlu1 %1241 }
 0x827   : > { %v1244_v6 = vmul.f32 0.010416667, %v1242_v61  ;;  %1251 = vadd.xlane.f32.xlu0 %v1249_v2 }
 0x829   : > { %v1246_v7 = vsub.f32 %v1238_v58, %v1244_v6 }
 0x82b   : > { %v1248_v63 = vmul.f32 %v2610_v3, %v1246_v7 }
 0x82d   : > { %v1250_v8 = vmul.f32 %v1248_v63, %v1248_v63 }
 0x82f   : > { %1253 = vadd.xlane.f32.xlu2 %v1250_v8 }
 0x89a   : > { %v1252_v19 = vpop.xlane.xlu0 %1251 }
 0x89b   : > { %v1255_v20 = vmul.f32 0.010416667, %v1252_v19 }
 0x89d   : > { %v1257_v22 = vadd.f32 1e-05, %v1255_v20 }
 0x89f   : > { %2206 = vrsqrt.f32 %v1257_v22  ;;  %vm1265_vm12 = vweird.f32 %v1257_v22 }
 0x8a2   : > { %v1254_v23 = vpop.xlane.xlu2 %1253 }
 0x8a3   : > { %v1256_v24 = vmul.f32 0.010416667, %v1254_v23 }
 0x8a5   : > { %v2207_v25 = vpop.eup %2206  ;;  %v1258_v26 = vadd.f32 1e-05, %v1256_v24 }
 0x8a6   : > { %v1260_v0 = vmul.f32 %v2207_v25, %v1257_v22  ;;  %vm1266_vm11 = vweird.f32 %v2207_v25 }
 0x8a7   : > { %2208 = vrsqrt.f32 %v1258_v26  ;;  %vm1267_vm14 = vmor %vm1265_vm12, %vm1266_vm11  ;;  %vm1275_vm0 = vweird.f32 %v1258_v26 }
 0x8a8   : > { %v1261_v54 = vmul.f32 %v2207_v25, %v1260_v0 }
 0x8aa   : > { %v1262_v27 = vmul.f32 0.5, %v1261_v54 }
 0x8ac   : > { %v1263_v28 = vsub.f32 1.5, %v1262_v27 }
 0x8ad   : > { %v2209_v29 = vpop.eup %2208 }
 0x8ae   : > { %v1264_v30 = vmul.f32 %v2207_v25, %v1263_v28  ;;  %v1270_v31 = vmul.f32 %v2209_v29, %v1258_v26  ;;  %vm1276_vm15 = vweird.f32 %v2209_v29 }
 0x8af   : > { %vm1277_vm1 = vmor %vm1275_vm0, %vm1276_vm15 }
 0x8b0   : > { %v1268_v34 = vsel %vm1267_vm14, %v2207_v25, %v1264_v30  ;;  %v1271_v35 = vmul.f32 %v2209_v29, %v1270_v31 }
 0x8b1   : > { %v1279_v37 = vmul.f32 %v1268_v34, %v1247_v1 }
 0x8b2   : > { %v1272_v38 = vmul.f32 0.5, %v1271_v35 }
 0x8b3   : > { %v1282_v39 = vmul.f32 %v1281_v33, %v1279_v37 }
 0x8b4   : > { %v1273_v41 = vsub.f32 1.5, %v1272_v38 }
 0x8b5   : > { %v1285_v32 = vadd.f32 %v1284_v40, %v1282_v39 }
 0x8b6   : > { %v1274_v42 = vmul.f32 %v2209_v29, %v1273_v41 }
 0x8b7   : > { %v1287_v45 = vmul.f32 %v2610_v3, %v1285_v32 }
 0x8b8   : > { %v1278_v43 = vsel %vm1277_vm1, %v2209_v29, %v1274_v42 }
 0x8b9   : > { %v1280_v17 = vmul.f32 %v1278_v43, %v1248_v63  ;;  %v1291_v48 = vmul.f32 0.01, %v1287_v45  ;;  %vm1289_vm2 = vcmp.ge.f32.partialorder %v1287_v45, 0.0 }
 0x8bb   : > { %v1283_v44 = vmul.f32 %v1281_v33, %v1280_v17  ;;  %v1293_v49 = vsel %vm1289_vm2, %v1287_v45, %v1291_v48 }
 0x8bd   : > { %v1286_v46 = vadd.f32 %v1284_v40, %v1283_v44 }
 0x8bf   : > { %v1288_v47 = vmul.f32 %v2610_v3, %v1286_v46  ;;  %v2025_v3 = vadd.f32 -1.0, %v496_v52 }
 0x8c1   : > { %vm1290_vm3 = vcmp.ge.f32.partialorder %v1288_v47, 0.0  ;;  %v1292_v14 = vmul.f32 0.01, %v1288_v47  ;;  %v1459_v56 = vmul.f32 1e+30, %v2025_v3 }
 0x8c3   : > { %v1294_v4 = vsel %vm1290_vm3, %v1288_v47, %v1292_v14 }
 0x8c4   : > { %v1312_v36 = vpack.c.bf16 %v1294_v4, %v1293_v49 }
 0x8c6   : > { %1370 = vmatmul.bf16.vlgmr.msrb.gmra.mxu1 %v1312_v36 }
 0x8d6   : > { %1375 = vmatmul.bf16.gmra.mxu1 %v2663_v57  ;;  %v2026_v57 = vadd.f32 -1.0, %v497_v60 }
 0x8d8   : > { %v1460_v1 = vmul.f32 1e+30, %v2026_v57 }
 0x943   : > { %v1371_v51 = vpop.f32.mrf.mxu1 }
 0x944   : > { %v1372_v55 = vadd.f32 %v1371_v51, %v1313_v50 }
 0x946   : > { %1416 = vrot.lane.b32.xlu1 %v1372_v55, %s2419_s5 }
 0x94b   : > { %v1373_v58 = vpop.f32.mrf.mxu1 }
 0x94c   : > { %v1374_v59 = vadd.f32 %v1373_v58, %v1313_v50 }
 0x94e   : > { %1418 = vrot.lane.b32.xlu0 %v1374_v59, %s2419_s5  ;;  %1463 = vperm.xlu1 %2179, %v1459_v56  }
 0x953   : > { %v1376_v62 = vpop.f32.mrf.mxu1 }
 0x954   : > { %v1377_v2 = vadd.f32 %v1376_v62, %v1313_v50 }
 0x956   : > { %1424 = vrot.lane.b32.xlu2 %v1377_v2, %s2419_s5  ;;  %2020 = vmatpush.msk.msra.mxu3 %vm833_vm9, %v1377_v2 }
 0x957   : > { %1468 = vperm.xlu0 %2181, %v1460_v1   ;;  %1558 = vrot.lane.b32.xlu1 %v1374_v59, %s2421_s13 }
 0x958   : > { %2021 = vmatmul.msk.f32.vlgmr.msra.gmra.mxu3 %vm826_vm10, %v2688_v11 }
 0x95b   : > { %v1378_v61 = vpop.f32.mrf.mxu1 }
 0x95e   : > { %1556 = vrot.lane.b32.xlu2 %v1372_v55, %s2421_s13  ;;  %v2095_v55 = vld [vmem:[%s2619_s12 + $0x10] sm:$0xff] }
 0x95f   : > { %1638 = vperm.xlu0 %2181, %v496_v52   ;;  %1643 = vperm.xlu1 %2179, %v497_v60   ;;  %v2096_v52 = vld [vmem:[%s2619_s12 + $0x18] sm:$0xff]  ;;  %s2422_s12 = smov [#allocation9]  }
 0x960   : > { %2022 = vmatmul.msk.f32.gmra.mxu3 %vm826_vm10, %v2696_v13  ;;  %s1656_s5 = sshll.u32 %s2422_s12, 4  ;;  %s1657_s5 = int_to_ptr.vmem [resolvable:$true] %s1656_s5 }
 0x961   : > { %1626 = vmatpush.bf16.msrb.mxu3 %v2096_v52 }
 0x965   : > { %1627 = vmatpush.bf16.msrb.mxu3 %v2095_v55 }
 0x966   : > { %1552 = vrot.lane.b32.xlu2 %v1377_v2, %s2421_s13 }
 0x9b0   : > { %v1425_v53 = vpop.permute.xlu2 %1424 }
 0x9b1   : > { %v1427_v23 = vmul.f32 %v1425_v53, %v1377_v2 }
 0x9b3   : > { %v1429_v24 = vpack.c.bf16 %v1427_v23, %v1427_v23 }
 0x9b8   : > { %v1417_v6 = vpop.permute.xlu1 %1416  ;;  %v1557_v62 = vpop.permute.xlu2 %1556 }
 0x9c0   : > { %v1419_v7 = vpop.permute.xlu0 %1418  ;;  %v1464_v63 = vpop.permute.xlu1 %1463 }
 0x9c9   : > { %v1469_v8 = vpop.permute.xlu0 %1468  ;;  %v2850_v9 = vpop.permute.xlu1 %1558 }
 0x9d1   : > { %v1639_v10 = vpop.permute.xlu0 %1638  ;;  %v1644_v12 = vpop.permute.xlu1 %1643 }
 0x9d2   : > { %v1646_v15 = vmul.f32 %v1639_v10, %v1293_v49  ;;  %v1647_v16 = vmul.f32 %v1644_v12, %v1294_v4 }
 0x9d4   : > { %1648 = vst [vmem:[#allocation9] sm:$0xff] %v1646_v15 }
 0x9d5   : > { %1649 = vst [vmem:[#allocation9 + $0x8] sm:$0xff] %v1647_v16 }
 0x9d6   : > { %2106 = dma.vmem_to_hbm [thread:$0]  (%p2127_p7), %s1657_s5, 256, %s1659_s23, [#allocation5], %s2423_s20, %s2423_s20, %s2424_s19  }
 0x9db   : > { %v1408_v18 = vpop.f32.mrf.mxu3 }
 0x9dc   : > { %v1422_v20 = vmul.f32 %v1417_v6, %v1408_v18 }
 0x9e3   : > { %v1411_v19 = vpop.f32.mrf.mxu3 }
 0x9e4   : > { %v1423_v21 = vmul.f32 %v1419_v7, %v1411_v19 }
 0x9e6   : > { %v1428_v22 = vpack.c.bf16 %v1423_v21, %v1422_v20 }
 0x9e8   : > { %2023 = vmatmul.msk.bf16.vlgmr.msra.gmra.mxu0 %vm905_vm13, %v1428_v22 }
 0x9f8   : > { %2024 = vmatmul.msk.bf16.gmra.mxu0 %vm905_vm13, %v1429_v24 }
 0xa65   : > { %v1445_v25 = vpop.f32.mrf.mxu0 }
 0xa66   : > { %v1454_v26 = vmul.f32 0.35355338, %v1445_v25 }
 0xa68   : > { %v1471_v0 = vadd.f32 %v1464_v63, %v1454_v26 }
 0xa6a   : > { %v1473_v54 = vsel %vm905_vm13, %v1471_v0, -inf }
 0xa6b   : > { %v1474_v27 = vrot.slane %v1473_v54, 4 }
 0xa6d   : > { %v1475_v28 = vmax.f32 %v1473_v54, %v1474_v27  ;;  %v1447_v29 = vpop.f32.mrf.mxu0 }
 0xa6e   : > { %v1455_v30 = vmul.f32 0.35355338, %v1447_v29 }
 0xa6f   : > { %v1476_v33 = vrot.slane %v1475_v28, 2 }
 0xa70   : > { %v1472_v31 = vadd.f32 %v1469_v8, %v1455_v30 }
 0xa71   : > { %v1477_v37 = vmax.f32 %v1475_v28, %v1476_v33 }
 0xa72   : > { %v1480_v34 = vsel %vm905_vm13, %v1472_v31, -inf }
 0xa73   : > { %v1481_v35 = vrot.slane %v1480_v34, 4  ;;  %v1478_v32 = vrot.slane %v1477_v37, 1 }
 0xa75   : > { %v1482_v38 = vmax.f32 %v1480_v34, %v1481_v35  ;;  %v1450_v39 = vpop.f32.mrf.mxu0  ;;  %v1479_v17 = vmax.f32 %v1477_v37, %v1478_v32 }
 0xa76   : > { %v1456_v42 = vmul.f32 0.35355338, %v1450_v39 }
 0xa77   : > { %v1483_v40 = vrot.slane %v1482_v38, 2 }
 0xa78   : > { %v1488_v44 = vrot.slane %v1456_v42, 1  ;;  %v1491_v48 = vmax.f32 %v1479_v17, %v1456_v42 }
 0xa79   : > { %v1484_v41 = vmax.f32 %v1482_v38, %v1483_v40 }
 0xa7b   : > { %v1485_v43 = vrot.slane %v1484_v41, 1 }
 0xa7d   : > { %v1452_v45 = vpop.f32.mrf.mxu0  ;;  %v1486_v46 = vmax.f32 %v1484_v41, %v1485_v43 }
 0xa7f   : > { %v1492_v47 = vmax.f32 %v1486_v46, %v1488_v44 }
 0xa81   : > { %v1495_v14 = vrot.slane %v1492_v47, 7 }
 0xa83   : > { %v1497_v49 = vsel %vm1496_vm4, %v1495_v14, %v1491_v48 }
 0xa84   : > { %2027 = vmatpush.msk.msrb.mxu2 %vm833_vm9, %v1497_v49  ;;  %v1530_v4 = vsub.f32 %v1456_v42, %v1497_v49  ;;  %v1553_v42 = vpop.permute.xlu2 %1552  ;;  %v1604_v49 = vperm.slane %v2617_v5, 1 }
 0xa85   : > { %2028 = vmatmul.msk.f32.vlgmr.msrb.gmra.mxu2 %vm826_vm10, %v2688_v11 }
 0xa86   : > { %v1531_v8 = vmul.f32 1.442695, %v1530_v4 }
 0xa8d   : > { %2029 = vmatmul.msk.f32.gmra.mxu2 %vm826_vm10, %v2696_v13 }
 0xb08   : > { %v1517_v36 = vpop.f32.mrf.mxu2 }
 0xb09   : > { %v1523_v50 = vsub.f32 %v1471_v0, %v1517_v36 }
 0xb0b   : > { %v1525_v51 = vmul.f32 1.442695, %v1523_v50 }
 0xb0d   : > { %2210 = vpow2.f32 %v1525_v51 }
 0xb10   : > { %v1520_v3 = vpop.f32.mrf.mxu2 }
 0xb11   : > { %v1524_v56 = vsub.f32 %v1472_v31, %v1520_v3 }
 0xb13   : > { %v2211_v58 = vpop.eup %2210  ;;  %v1527_v59 = vmul.f32 1.442695, %v1524_v56 }
 0xb14   : > { %v1533_v60 = vsel %vm905_vm13, %v2211_v58, 0.0  ;;  %v1562_v2 = vmul.f32 %v2211_v58, %v1557_v62 }
 0xb15   : > { %v1534_v57 = vrot.slane %v1533_v60, 4  ;;  %2212 = vpow2.f32 %v1527_v59 }
 0xb16   : > { %v1564_v12 = vsel %vm905_vm13, %v1562_v2, 0.0  ;;  %2214 = vpow2.f32 %v1531_v8 }
 0xb17   : > { %v1535_v11 = vadd.f32 %v1534_v57, %v1533_v60  ;;  %v1565_v19 = vrot.slane %v1564_v12, 4 }
 0xb19   : > { %v1536_v13 = vrot.slane %v1535_v11, 2  ;;  %v1566_v23 = vadd.f32 %v1565_v19, %v1564_v12 }
 0xb1b   : > { %v2213_v1 = vpop.eup %2212  ;;  %v1537_v10 = vadd.f32 %v1536_v13, %v1535_v11  ;;  %v1567_v54 = vrot.slane %v1566_v23, 2 }
 0xb1c   : > { %v1540_v61 = vsel %vm905_vm13, %v2213_v1, 0.0  ;;  %v1563_v6 = vmul.f32 %v2213_v1, %v2850_v9  ;;  %v2215_v26 = vpop.eup %2214 }
 0xb1d   : > { %v1541_v7 = vrot.slane %v1540_v61, 4  ;;  %v1538_v20 = vrot.slane %v1537_v10, 1  ;;  %v1568_v29 = vadd.f32 %v1567_v54, %v1566_v23  ;;  %v1555_v43 = vmul.f32 %v2215_v26, %v1553_v42 }
 0xb1e   : > { %v1571_v63 = vsel %vm905_vm13, %v1563_v6, 0.0 }
 0xb1f   : > { %v1542_v15 = vadd.f32 %v1541_v7, %v1540_v61  ;;  %v1572_v16 = vrot.slane %v1571_v63, 4  ;;  %v1539_v24 = vadd.f32 %v1538_v20, %v1537_v10  ;;  %v1569_v33 = vrot.slane %v1568_v29, 1 }
 0xb21   : > { %v1543_v18 = vrot.slane %v1542_v15, 2  ;;  %v1573_v22 = vadd.f32 %v1572_v16, %v1571_v63  ;;  %v1570_v38 = vadd.f32 %v1569_v33, %v1568_v29 }
 0xb23   : > { %v1544_v21 = vadd.f32 %v1543_v18, %v1542_v15  ;;  %v1574_v9 = vrot.slane %v1573_v22, 2 }
 0xb25   : > { %v1545_v53 = vrot.slane %v1544_v21, 1  ;;  %v1575_v28 = vadd.f32 %v1574_v9, %v1573_v22 }
 0xb27   : > { %v1546_v25 = vadd.f32 %v1545_v53, %v1544_v21  ;;  %v1576_v30 = vrot.slane %v1575_v28, 1 }
 0xb29   : > { %v1549_v0 = vsel %vm1496_vm4, %v1546_v25, %v1539_v24  ;;  %v1577_v35 = vadd.f32 %v1576_v30, %v1575_v28 }
 0xb2a   : > { %v1551_v27 = vadd.f32 %v2215_v26, %v1549_v0 }
 0xb2b   : > { %v1580_v32 = vsel %vm1496_vm4, %v1577_v35, %v1570_v38 }
 0xb2c   : > { %2216 = vrcp.f32 %v1551_v27  ;;  %v1594_v39 = vand.u32 2147483648, %v1551_v27  ;;  %v1592_v41 = vand.u32 2147483647, %v1551_v27  ;;  %vm1588_vm10 = vweird.f32 %v1551_v27 }
 0xb2d   : > { %v1582_v45 = vadd.f32 %v1580_v32, %v1555_v43 }
 0xb2e   : > { %v1595_v44 = vor.u32 1.1754944e-38, %v1594_v39  ;;  %vm1593_vm6 = vcmp.eq.f32.partialorder %v1592_v41, 8.507059e+37 }
 0xb32   : > { %v2217_v31 = vpop.eup %2216 }
 0xb33   : > { %v1584_v34 = vmul.f32 %v2217_v31, %v1551_v27  ;;  %vm1589_vm9 = vweird.f32 %v2217_v31 }
 0xb34   : > { %vm1590_vm5 = vmor %vm1588_vm10, %vm1589_vm9 }
 0xb35   : > { %v1585_v37 = vsub.f32 1.0, %v1584_v34 }
 0xb37   : > { %v1586_v40 = vmul.f32 %v2217_v31, %v1585_v37 }
 0xb39   : > { %v1587_v17 = vadd.f32 %v2217_v31, %v1586_v40 }
 0xb3b   : > { %v1591_v46 = vsel %vm1590_vm5, %v2217_v31, %v1587_v17 }
 0xb3c   : > { %v1596_v47 = vsel %vm1593_vm6, %v1595_v44, %v1591_v46 }
 0xb3d   : > { %v1597_v48 = vmul.f32 %v1596_v47, %v1582_v45 }
 0xb3f   : > { %v1603_v14 = vpack.c.bf16 %v1597_v48, %v1597_v48 }
 0xb41   : > { %2042 = vmatmul.msk.bf16.vlgmr.msrb.gmra.mxu3 %vm905_vm13, %v1603_v14 }
 0xbc4   : > { %v1629_v4 = vpop.f32.mrf.mxu3 }
 0xbc5   : > { %v1630_v36 = vadd.f32 %v1629_v4, %v1604_v49 }
 0xbc7   : > { %vm1633_vm13 = vcmp.ge.f32.partialorder %v1630_v36, 0.0  ;;  %v1634_v50 = vmul.f32 0.01, %v1630_v36 }
 0xbc9   : > { %v1635_v51 = vsel %vm1633_vm13, %v1630_v36, %v1634_v50 }
 0xbca   : > { %1650 = vst [vmem:[#allocation10] sm:$0x3] %v1635_v51 }
 0xbcb   : > { %2108 = dma.vmem_to_hbm [thread:$0]  (%p2127_p7), %s1672_s29, 128, %s1674_s30, [#allocation11]  }
 0xbcc   : > { %v1631_v52 = vpop.f32.mrf.mxu3 }
 0xbcd   : > { %2389 = dma.done.wait (%p2127_p7), [#allocation5], 256  }
 0xbce   : > { %2391 = vsyncadd (%p2127_p7), [#allocation5], 4294967040 }
 0xbcf   : > { %2393 = dma.done.wait (%p2127_p7), [#allocation11], 128  }
 0xbd0   : > { %2395 = vsyncadd (%p2127_p7), [#allocation11], 4294967168 }
 0xbd1 PF: > { %s2929_s16 = sld [smem:[#allocation16_spill]]  ;;  %p24_p1 = scmp.ge.s32.totalorder %s2502_s17, 4  }
 0xbd2   : > { %s2930_s15 = sld [smem:[#allocation17_spill]]  ;;  %s2931_s13 = smov %s2402_s14 }
 0xbd3   :  { %26 = sbr.rel (!%p24_p1) target bundleno = 8 (0x8), region = 128 }
 0xbd7   : > { %s2932_s14 = smov %s2929_s16  ;;  %s2933_s16 = smov %s2502_s17 }
 0xbd8   :  { %1692 = vsyncpa [#allocation4], 1 }
 0xbd9   :  { %1694 = vsyncpa [#allocation4 + $0x1], 1 }
 0xbda   :  { %1695 = vsyncpa [#allocation7], 1 }
 0xbdb   :  { %1697 = vsyncpa [#allocation7 + $0x1], 1 }
 0xbdc   :  { %1698 = vsyncpa [#allocation5], 1 }
 0xbdd   :  { %1700 = vsyncpa [#allocation5 + $0x1], 1 }
 0xbde   :  { %1701 = vsyncpa [#allocation11], 1 }

</bundles_post_ra>
